<compile_context>
chip_gen: v6e
topology: v6e:2x2x1
jax: 0.10.0
libtpu: 0.0.40
codegen_flags: <defaults>
</compile_context>

<pallas_src>
import math

import jax
import jax.numpy as jnp
from jax.experimental import pallas as pl
from jax.experimental.pallas import tpu as pltpu

# ---- Langevin hyperparameters (constructor args, compile-time constants) ----
ETA = 0.01
BETA = 1.0
C_FWD = math.sqrt(2.0 * ETA / BETA)     # scale on the forward noise
C_BWD = math.sqrt(BETA * ETA / 2.0)     # scale on (grad_u + grad_u_next)

# ---- potential_fn modeled as a small residual-GELU MLP (ndim -> ndim) -------
NDIM = 4
HIDDEN = 40
LAYERS = 4

# ---- problem size ------------------------------------------------------------
BATCH = 128          # number of walkers processed per call
B_TILE = 64          # batch tile (2 tiles -> "parallel" axis for v7x megacore)
STEPS = 8            # Langevin steps fused into one pallas_call


def _gelu_exact(x):
    # PyTorch nn.GELU() default: exact erf formulation.
    return 0.5 * x * (1.0 + jax.lax.erf(x * (1.0 / math.sqrt(2.0))))


def _mlp(x, w_in, b_in, w_blk_ref, b_blk_ref, w_out, b_out):
    """Residual-GELU MLP applied to a VMEM-resident batch tile."""
    h = jnp.dot(x, w_in, preferred_element_type=jnp.float32) + b_in
    h = _gelu_exact(h)
    for l in range(LAYERS):                      # static unroll, tiny chain
        t = jnp.dot(h, w_blk_ref[l], preferred_element_type=jnp.float32)
        h = h + _gelu_exact(t + b_blk_ref[l])
    return jnp.dot(h, w_out, preferred_element_type=jnp.float32) + b_out


def langevin_kernel(y_ref, noise_ref, w_in_ref, b_in_ref, w_blk_ref, b_blk_ref,
                    w_out_ref, b_out_ref, y_traj_ref, ds_ref, y_carry):
    """One Langevin step for one batch tile; y carried in VMEM across steps."""
    k = pl.program_id(1)

    # Start of a new trajectory for this batch tile: load initial y.
    @pl.when(k == 0)
    def _():
        y_carry[...] = y_ref[...]

    y = y_carry[...]                                  # (B_TILE, NDIM), f32
    noise_fwd = noise_ref[0]                          # (B_TILE, NDIM)

    # Weights are VMEM-resident across the whole grid (constant index_maps);
    # loaded once per step and reused by both potential evaluations.
    w_in = w_in_ref[...]
    b_in = b_in_ref[...]
    w_out = w_out_ref[...]
    b_out = b_out_ref[...]

    grad_u = _mlp(y, w_in, b_in, w_blk_ref, b_blk_ref, w_out, b_out)

    y_next = y - ETA * grad_u + C_FWD * noise_fwd

    grad_u_next = _mlp(y_next, w_in, b_in, w_blk_ref, b_blk_ref, w_out, b_out)

    # noise_bwd = a - noise_fwd  with  a = C_BWD*(grad_u + grad_u_next)
    # => noise_bwd^2 - noise_fwd^2 = a*(a - 2*noise_fwd)   (factored form)
    a = C_BWD * (grad_u + grad_u_next)
    ds = -0.5 * jnp.sum(a * (a - 2.0 * noise_fwd), axis=-1, keepdims=True)

    y_carry[...] = y_next                             # carry to next step
    y_traj_ref[0] = y_next.astype(y_traj_ref.dtype)
    ds_ref[0] = ds.astype(ds_ref.dtype)


@jax.jit
def langevin_trajectory_pallas(y0, noise, w_in, b_in, w_blk, b_blk, w_out,
                               b_out):
    """Runs STEPS fused Langevin steps; returns per-step (y_next, delta_S)."""
    B = y0.shape[0]
    K = noise.shape[0]
    n_btiles = B // B_TILE

    grid_spec = pltpu.PrefetchScalarGridSpec(
        num_scalar_prefetch=0,
        grid=(n_btiles, K),                          # (batch tiles, steps)
        in_specs=[
            # initial state: re-fetched only when the batch tile changes
            pl.BlockSpec((B_TILE, NDIM), lambda i, k: (i, 0)),
            # per-step forward noise: pipelined along the step axis
            pl.BlockSpec((1, B_TILE, NDIM), lambda i, k: (k, i, 0)),
            # weights: constant block index -> DMA'd once, VMEM-resident
            pl.BlockSpec((NDIM, HIDDEN), lambda i, k: (0, 0)),
            pl.BlockSpec((1, HIDDEN), lambda i, k: (0, 0)),
            pl.BlockSpec((LAYERS, HIDDEN, HIDDEN), lambda i, k: (0, 0, 0)),
            pl.BlockSpec((LAYERS, 1, HIDDEN), lambda i, k: (0, 0, 0)),
            pl.BlockSpec((HIDDEN, NDIM), lambda i, k: (0, 0)),
            pl.BlockSpec((1, NDIM), lambda i, k: (0, 0)),
        ],
        out_specs=[
            pl.BlockSpec((1, B_TILE, NDIM), lambda i, k: (k, i, 0)),
            pl.BlockSpec((1, B_TILE, 1), lambda i, k: (k, i, 0)),
        ],
        scratch_shapes=[
            pltpu.VMEM((B_TILE, NDIM), jnp.float32),   # y carried across steps
        ],
    )

    y_traj, ds = pl.pallas_call(
        langevin_kernel,
        out_shape=(jax.ShapeDtypeStruct((K, B, NDIM), jnp.float32),
                   jax.ShapeDtypeStruct((K, B, 1), jnp.float32)),
        grid_spec=grid_spec,
        compiler_params=pltpu.CompilerParams(
            # batch tiles are independent (v7x megacore); steps are sequential
            dimension_semantics=("parallel", "arbitrary")),
    )(y0, noise, w_in, b_in, w_blk, b_blk, w_out, b_out)

    return y_traj, ds[:, :, 0]


def make_params(key):
    """Deterministic synthetic MLP parameters (the modeled potential_fn)."""
    ks = jax.random.split(key, 6)
    s = 0.2
    w_in = s * jax.random.normal(ks[0], (NDIM, HIDDEN), jnp.float32)
    b_in = s * jax.random.normal(ks[1], (1, HIDDEN), jnp.float32)
    w_blk = s * jax.random.normal(ks[2], (LAYERS, HIDDEN, HIDDEN), jnp.float32)
    b_blk = s * jax.random.normal(ks[3], (LAYERS, 1, HIDDEN), jnp.float32)
    w_out = s * jax.random.normal(ks[4], (HIDDEN, NDIM), jnp.float32)
    b_out = s * jax.random.normal(ks[5], (1, NDIM), jnp.float32)
    return w_in, b_in, w_blk, b_blk, w_out, b_out


def langevin_reference(y0, noise, w_in, b_in, w_blk, b_blk, w_out, b_out):
    """Pure-JAX reference: one module forward per step, direct delta_S form."""
    def mlp(x):
        h = _gelu_exact(x @ w_in + b_in)
        for l in range(LAYERS):
            h = h + _gelu_exact(h @ w_blk[l] + b_blk[l])
        return h @ w_out + b_out

    y = y0
    ys, dss = [], []
    for k in range(noise.shape[0]):
        nf = noise[k]
        grad_u = mlp(y)
        y_next = y - ETA * grad_u + C_FWD * nf
        grad_u_next = mlp(y_next)
        noise_bwd = C_BWD * (grad_u + grad_u_next) - nf
        ds = -0.5 * jnp.sum(noise_bwd ** 2 - nf ** 2, axis=-1)
        ys.append(y_next)
        dss.append(ds)
        y = y_next
    return jnp.stack(ys), jnp.stack(dss)


if __name__ == "__main__":
    key = jax.random.PRNGKey(0)
    ky, kn, kp = jax.random.split(key, 3)
    y0 = jax.random.normal(ky, (BATCH, NDIM), jnp.float32)
    noise = jax.random.normal(kn, (STEPS, BATCH, NDIM), jnp.float32)
    params = make_params(kp)

    y_traj, ds = langevin_trajectory_pallas(y0, noise, *params)
    (y_traj, ds) = jax.block_until_ready((y_traj, ds))

    y_ref, ds_ref = langevin_reference(y0, noise, *params)
    assert y_traj.shape == (STEPS, BATCH, NDIM)
    assert ds.shape == (STEPS, BATCH)
    assert jnp.allclose(y_traj, y_ref, atol=1e-5, rtol=1e-5), (
        float(jnp.max(jnp.abs(y_traj - y_ref))))
    assert jnp.allclose(ds, ds_ref, atol=1e-5, rtol=1e-5), (
        float(jnp.max(jnp.abs(ds - ds_ref))))

    print("KERNEL_OK")
</pallas_src>

<mosaic_0001>
module attributes {stable_mosaic.version = 11 : i64} {
  func.func @langevin_kernel(%arg0: i32, %arg1: i32, %arg2: memref<64x4xf32, #tpu.memory_space<vmem>>, %arg3: memref<1x64x4xf32, #tpu.memory_space<vmem>>, %arg4: memref<4x40xf32, #tpu.memory_space<vmem>>, %arg5: memref<1x40xf32, #tpu.memory_space<vmem>>, %arg6: memref<4x40x40xf32, #tpu.memory_space<vmem>>, %arg7: memref<4x1x40xf32, #tpu.memory_space<vmem>>, %arg8: memref<40x4xf32, #tpu.memory_space<vmem>>, %arg9: memref<1x4xf32, #tpu.memory_space<vmem>>, %arg10: memref<1x64x4xf32, #tpu.memory_space<vmem>>, %arg11: memref<1x64x1xf32, #tpu.memory_space<vmem>>, %arg12: memref<64x4xf32, #tpu.memory_space<vmem>>) attributes {dimension_semantics = [#tpu.dimension_semantics<parallel>, #tpu.dimension_semantics<arbitrary>], iteration_bounds = array<i64: 2, 8>, scalar_prefetch = 0 : i64, scratch_operands = 1 : i64, tpu.core_type = #tpu.core_type<tc>, window_params = [{transform_indices = @transform_0, window_bounds = array<i64: 64, 4>}, {transform_indices = @transform_1, window_bounds = array<i64: 1, 64, 4>}, {pipeline_mode = #tpu.pipeline_mode<synchronous>, transform_indices = @transform_2, window_bounds = array<i64: 4, 40>}, {pipeline_mode = #tpu.pipeline_mode<synchronous>, transform_indices = @transform_3, window_bounds = array<i64: 1, 40>}, {pipeline_mode = #tpu.pipeline_mode<synchronous>, transform_indices = @transform_4, window_bounds = array<i64: 4, 40, 40>}, {pipeline_mode = #tpu.pipeline_mode<synchronous>, transform_indices = @transform_5, window_bounds = array<i64: 4, 1, 40>}, {pipeline_mode = #tpu.pipeline_mode<synchronous>, transform_indices = @transform_6, window_bounds = array<i64: 40, 4>}, {pipeline_mode = #tpu.pipeline_mode<synchronous>, transform_indices = @transform_7, window_bounds = array<i64: 1, 4>}, {transform_indices = @transform_8, window_bounds = array<i64: 1, 64, 4>}, {transform_indices = @transform_9, window_bounds = array<i64: 1, 64, 1>}]} {
    %c0_i32 = arith.constant 0 : i32
    %0 = arith.cmpi eq, %arg1, %c0_i32 : i32
    %1 = arith.extui %0 : i1 to i32
    %c0_i32_0 = arith.constant 0 : i32
    %2 = arith.cmpi ne, %1, %c0_i32_0 : i32
    scf.if %2 {
      %c0_113 = arith.constant 0 : index
      %c0_114 = arith.constant 0 : index
      %190 = vector.load %arg2[%c0_113, %c0_114] : memref<64x4xf32, #tpu.memory_space<vmem>>, vector<64x4xf32>
      %c0_115 = arith.constant 0 : index
      %c0_116 = arith.constant 0 : index
      %191 = vector.load %arg12[%c0_115, %c0_116] : memref<64x4xf32, #tpu.memory_space<vmem>>, vector<64x4xf32>
      tpu.vector_store %arg12[%c0_115, %c0_116], %190 {strides = array<i32>} : memref<64x4xf32, #tpu.memory_space<vmem>>, vector<64x4xf32>,
    } else {
    }
    %c0 = arith.constant 0 : index
    %c0_1 = arith.constant 0 : index
    %3 = vector.load %arg12[%c0, %c0_1] : memref<64x4xf32, #tpu.memory_space<vmem>>, vector<64x4xf32>
    %c0_2 = arith.constant 0 : index
    %c0_3 = arith.constant 0 : index
    %c0_4 = arith.constant 0 : index
    %4 = vector.load %arg3[%c0_2, %c0_3, %c0_4] : memref<1x64x4xf32, #tpu.memory_space<vmem>>, vector<1x64x4xf32>
    %5 = vector.shape_cast %4 : vector<1x64x4xf32> to vector<64x4xf32>
    %c0_5 = arith.constant 0 : index
    %c0_6 = arith.constant 0 : index
    %6 = vector.load %arg4[%c0_5, %c0_6] : memref<4x40xf32, #tpu.memory_space<vmem>>, vector<4x40xf32>
    %c0_7 = arith.constant 0 : index
    %c0_8 = arith.constant 0 : index
    %7 = vector.load %arg5[%c0_7, %c0_8] : memref<1x40xf32, #tpu.memory_space<vmem>>, vector<1x40xf32>
    %c0_9 = arith.constant 0 : index
    %c0_10 = arith.constant 0 : index
    %8 = vector.load %arg8[%c0_9, %c0_10] : memref<40x4xf32, #tpu.memory_space<vmem>>, vector<40x4xf32>
    %c0_11 = arith.constant 0 : index
    %c0_12 = arith.constant 0 : index
    %9 = vector.load %arg9[%c0_11, %c0_12] : memref<1x4xf32, #tpu.memory_space<vmem>>, vector<1x4xf32>
    %cst = arith.constant dense<0.000000e+00> : vector<64x40xf32>
    %10 = tpu.matmul %3, %6, %cst {dimension_numbers = #tpu.dot_dimension_numbers<[1], [0], [0], [1], [0, 0, 1, 1], [], []>} : vector<64x4xf32>, vector<4x40xf32>, vector<64x40xf32> -> vector<64x40xf32>
    %11 = vector.broadcast %7 : vector<1x40xf32> to vector<64x40xf32>
    %12 = arith.addf %10, %11 : vector<64x40xf32>
    %cst_13 = arith.constant 5.000000e-01 : f32
    %13 = vector.broadcast %cst_13 : f32 to vector<64x40xf32>
    %14 = arith.mulf %13, %12 : vector<64x40xf32>
    %cst_14 = arith.constant 0.707106769 : f32
    %15 = vector.broadcast %cst_14 : f32 to vector<64x40xf32>
    %16 = arith.mulf %12, %15 : vector<64x40xf32>
    %17 = math.erf %16 : vector<64x40xf32>
    %cst_15 = arith.constant 1.000000e+00 : f32
    %18 = vector.broadcast %cst_15 : f32 to vector<64x40xf32>
    %19 = arith.addf %18, %17 : vector<64x40xf32>
    %20 = arith.mulf %14, %19 : vector<64x40xf32>
    %c0_16 = arith.constant 0 : index
    %c0_17 = arith.constant 0 : index
    %c0_18 = arith.constant 0 : index
    %21 = vector.load %arg6[%c0_16, %c0_17, %c0_18] : memref<4x40x40xf32, #tpu.memory_space<vmem>>, vector<1x40x40xf32>
    %22 = vector.shape_cast %21 : vector<1x40x40xf32> to vector<40x40xf32>
    %cst_19 = arith.constant dense<0.000000e+00> : vector<64x40xf32>
    %23 = tpu.matmul %20, %22, %cst_19 {dimension_numbers = #tpu.dot_dimension_numbers<[1], [0], [0], [1], [0, 0, 1, 1], [], []>} : vector<64x40xf32>, vector<40x40xf32>, vector<64x40xf32> -> vector<64x40xf32>
    %c0_20 = arith.constant 0 : index
    %c0_21 = arith.constant 0 : index
    %c0_22 = arith.constant 0 : index
    %24 = vector.load %arg7[%c0_20, %c0_21, %c0_22] : memref<4x1x40xf32, #tpu.memory_space<vmem>>, vector<1x1x40xf32>
    %25 = vector.shape_cast %24 : vector<1x1x40xf32> to vector<1x40xf32>
    %26 = vector.broadcast %25 : vector<1x40xf32> to vector<64x40xf32>
    %27 = arith.addf %23, %26 : vector<64x40xf32>
    %cst_23 = arith.constant 5.000000e-01 : f32
    %28 = vector.broadcast %cst_23 : f32 to vector<64x40xf32>
    %29 = arith.mulf %28, %27 : vector<64x40xf32>
    %cst_24 = arith.constant 0.707106769 : f32
    %30 = vector.broadcast %cst_24 : f32 to vector<64x40xf32>
    %31 = arith.mulf %27, %30 : vector<64x40xf32>
    %32 = math.erf %31 : vector<64x40xf32>
    %cst_25 = arith.constant 1.000000e+00 : f32
    %33 = vector.broadcast %cst_25 : f32 to vector<64x40xf32>
    %34 = arith.addf %33, %32 : vector<64x40xf32>
    %35 = arith.mulf %29, %34 : vector<64x40xf32>
    %36 = arith.addf %20, %35 : vector<64x40xf32>
    %c1 = arith.constant 1 : index
    %c0_26 = arith.constant 0 : index
    %c0_27 = arith.constant 0 : index
    %37 = vector.load %arg6[%c1, %c0_26, %c0_27] : memref<4x40x40xf32, #tpu.memory_space<vmem>>, vector<1x40x40xf32>
    %38 = vector.shape_cast %37 : vector<1x40x40xf32> to vector<40x40xf32>
    %cst_28 = arith.constant dense<0.000000e+00> : vector<64x40xf32>
    %39 = tpu.matmul %36, %38, %cst_28 {dimension_numbers = #tpu.dot_dimension_numbers<[1], [0], [0], [1], [0, 0, 1, 1], [], []>} : vector<64x40xf32>, vector<40x40xf32>, vector<64x40xf32> -> vector<64x40xf32>
    %c1_29 = arith.constant 1 : index
    %c0_30 = arith.constant 0 : index
    %c0_31 = arith.constant 0 : index
    %40 = vector.load %arg7[%c1_29, %c0_30, %c0_31] : memref<4x1x40xf32, #tpu.memory_space<vmem>>, vector<1x1x40xf32>
    %41 = vector.shape_cast %40 : vector<1x1x40xf32> to vector<1x40xf32>
    %42 = vector.broadcast %41 : vector<1x40xf32> to vector<64x40xf32>
    %43 = arith.addf %39, %42 : vector<64x40xf32>
    %cst_32 = arith.constant 5.000000e-01 : f32
    %44 = vector.broadcast %cst_32 : f32 to vector<64x40xf32>
    %45 = arith.mulf %44, %43 : vector<64x40xf32>
    %cst_33 = arith.constant 0.707106769 : f32
    %46 = vector.broadcast %cst_33 : f32 to vector<64x40xf32>
    %47 = arith.mulf %43, %46 : vector<64x40xf32>
    %48 = math.erf %47 : vector<64x40xf32>
    %cst_34 = arith.constant 1.000000e+00 : f32
    %49 = vector.broadcast %cst_34 : f32 to vector<64x40xf32>
    %50 = arith.addf %49, %48 : vector<64x40xf32>
    %51 = arith.mulf %45, %50 : vector<64x40xf32>
    %52 = arith.addf %36, %51 : vector<64x40xf32>
    %c2 = arith.constant 2 : index
    %c0_35 = arith.constant 0 : index
    %c0_36 = arith.constant 0 : index
    %53 = vector.load %arg6[%c2, %c0_35, %c0_36] : memref<4x40x40xf32, #tpu.memory_space<vmem>>, vector<1x40x40xf32>
    %54 = vector.shape_cast %53 : vector<1x40x40xf32> to vector<40x40xf32>
    %cst_37 = arith.constant dense<0.000000e+00> : vector<64x40xf32>
    %55 = tpu.matmul %52, %54, %cst_37 {dimension_numbers = #tpu.dot_dimension_numbers<[1], [0], [0], [1], [0, 0, 1, 1], [], []>} : vector<64x40xf32>, vector<40x40xf32>, vector<64x40xf32> -> vector<64x40xf32>
    %c2_38 = arith.constant 2 : index
    %c0_39 = arith.constant 0 : index
    %c0_40 = arith.constant 0 : index
    %56 = vector.load %arg7[%c2_38, %c0_39, %c0_40] : memref<4x1x40xf32, #tpu.memory_space<vmem>>, vector<1x1x40xf32>
    %57 = vector.shape_cast %56 : vector<1x1x40xf32> to vector<1x40xf32>
    %58 = vector.broadcast %57 : vector<1x40xf32> to vector<64x40xf32>
    %59 = arith.addf %55, %58 : vector<64x40xf32>
    %cst_41 = arith.constant 5.000000e-01 : f32
    %60 = vector.broadcast %cst_41 : f32 to vector<64x40xf32>
    %61 = arith.mulf %60, %59 : vector<64x40xf32>
    %cst_42 = arith.constant 0.707106769 : f32
    %62 = vector.broadcast %cst_42 : f32 to vector<64x40xf32>
    %63 = arith.mulf %59, %62 : vector<64x40xf32>
    %64 = math.erf %63 : vector<64x40xf32>
    %cst_43 = arith.constant 1.000000e+00 : f32
    %65 = vector.broadcast %cst_43 : f32 to vector<64x40xf32>
    %66 = arith.addf %65, %64 : vector<64x40xf32>
    %67 = arith.mulf %61, %66 : vector<64x40xf32>
    %68 = arith.addf %52, %67 : vector<64x40xf32>
    %c3 = arith.constant 3 : index
    %c0_44 = arith.constant 0 : index
    %c0_45 = arith.constant 0 : index
    %69 = vector.load %arg6[%c3, %c0_44, %c0_45] : memref<4x40x40xf32, #tpu.memory_space<vmem>>, vector<1x40x40xf32>
    %70 = vector.shape_cast %69 : vector<1x40x40xf32> to vector<40x40xf32>
    %cst_46 = arith.constant dense<0.000000e+00> : vector<64x40xf32>
    %71 = tpu.matmul %68, %70, %cst_46 {dimension_numbers = #tpu.dot_dimension_numbers<[1], [0], [0], [1], [0, 0, 1, 1], [], []>} : vector<64x40xf32>, vector<40x40xf32>, vector<64x40xf32> -> vector<64x40xf32>
    %c3_47 = arith.constant 3 : index
    %c0_48 = arith.constant 0 : index
    %c0_49 = arith.constant 0 : index
    %72 = vector.load %arg7[%c3_47, %c0_48, %c0_49] : memref<4x1x40xf32, #tpu.memory_space<vmem>>, vector<1x1x40xf32>
    %73 = vector.shape_cast %72 : vector<1x1x40xf32> to vector<1x40xf32>
    %74 = vector.broadcast %73 : vector<1x40xf32> to vector<64x40xf32>
    %75 = arith.addf %71, %74 : vector<64x40xf32>
    %cst_50 = arith.constant 5.000000e-01 : f32
    %76 = vector.broadcast %cst_50 : f32 to vector<64x40xf32>
    %77 = arith.mulf %76, %75 : vector<64x40xf32>
    %cst_51 = arith.constant 0.707106769 : f32
    %78 = vector.broadcast %cst_51 : f32 to vector<64x40xf32>
    %79 = arith.mulf %75, %78 : vector<64x40xf32>
    %80 = math.erf %79 : vector<64x40xf32>
    %cst_52 = arith.constant 1.000000e+00 : f32
    %81 = vector.broadcast %cst_52 : f32 to vector<64x40xf32>
    %82 = arith.addf %81, %80 : vector<64x40xf32>
    %83 = arith.mulf %77, %82 : vector<64x40xf32>
    %84 = arith.addf %68, %83 : vector<64x40xf32>
    %cst_53 = arith.constant dense<0.000000e+00> : vector<64x4xf32>
    %85 = tpu.matmul %84, %8, %cst_53 {dimension_numbers = #tpu.dot_dimension_numbers<[1], [0], [0], [1], [0, 0, 1, 1], [], []>} : vector<64x40xf32>, vector<40x4xf32>, vector<64x4xf32> -> vector<64x4xf32>
    %86 = vector.broadcast %9 : vector<1x4xf32> to vector<64x4xf32>
    %87 = arith.addf %85, %86 : vector<64x4xf32>
    %cst_54 = arith.constant 0.00999999977 : f32
    %88 = vector.broadcast %cst_54 : f32 to vector<64x4xf32>
    %89 = arith.mulf %88, %87 : vector<64x4xf32>
    %90 = arith.subf %3, %89 : vector<64x4xf32>
    %cst_55 = arith.constant 0.141421363 : f32
    %91 = vector.broadcast %cst_55 : f32 to vector<64x4xf32>
    %92 = arith.mulf %91, %5 : vector<64x4xf32>
    %93 = arith.addf %90, %92 : vector<64x4xf32>
    %cst_56 = arith.constant dense<0.000000e+00> : vector<64x40xf32>
    %94 = tpu.matmul %93, %6, %cst_56 {dimension_numbers = #tpu.dot_dimension_numbers<[1], [0], [0], [1], [0, 0, 1, 1], [], []>} : vector<64x4xf32>, vector<4x40xf32>, vector<64x40xf32> -> vector<64x40xf32>
    %95 = vector.broadcast %7 : vector<1x40xf32> to vector<64x40xf32>
    %96 = arith.addf %94, %95 : vector<64x40xf32>
    %cst_57 = arith.constant 5.000000e-01 : f32
    %97 = vector.broadcast %cst_57 : f32 to vector<64x40xf32>
    %98 = arith.mulf %97, %96 : vector<64x40xf32>
    %cst_58 = arith.constant 0.707106769 : f32
    %99 = vector.broadcast %cst_58 : f32 to vector<64x40xf32>
    %100 = arith.mulf %96, %99 : vector<64x40xf32>
    %101 = math.erf %100 : vector<64x40xf32>
    %cst_59 = arith.constant 1.000000e+00 : f32
    %102 = vector.broadcast %cst_59 : f32 to vector<64x40xf32>
    %103 = arith.addf %102, %101 : vector<64x40xf32>
    %104 = arith.mulf %98, %103 : vector<64x40xf32>
    %c0_60 = arith.constant 0 : index
    %c0_61 = arith.constant 0 : index
    %c0_62 = arith.constant 0 : index
    %105 = vector.load %arg6[%c0_60, %c0_61, %c0_62] : memref<4x40x40xf32, #tpu.memory_space<vmem>>, vector<1x40x40xf32>
    %106 = vector.shape_cast %105 : vector<1x40x40xf32> to vector<40x40xf32>
    %cst_63 = arith.constant dense<0.000000e+00> : vector<64x40xf32>
    %107 = tpu.matmul %104, %106, %cst_63 {dimension_numbers = #tpu.dot_dimension_numbers<[1], [0], [0], [1], [0, 0, 1, 1], [], []>} : vector<64x40xf32>, vector<40x40xf32>, vector<64x40xf32> -> vector<64x40xf32>
    %c0_64 = arith.constant 0 : index
    %c0_65 = arith.constant 0 : index
    %c0_66 = arith.constant 0 : index
    %108 = vector.load %arg7[%c0_64, %c0_65, %c0_66] : memref<4x1x40xf32, #tpu.memory_space<vmem>>, vector<1x1x40xf32>
    %109 = vector.shape_cast %108 : vector<1x1x40xf32> to vector<1x40xf32>
    %110 = vector.broadcast %109 : vector<1x40xf32> to vector<64x40xf32>
    %111 = arith.addf %107, %110 : vector<64x40xf32>
    %cst_67 = arith.constant 5.000000e-01 : f32
    %112 = vector.broadcast %cst_67 : f32 to vector<64x40xf32>
    %113 = arith.mulf %112, %111 : vector<64x40xf32>
    %cst_68 = arith.constant 0.707106769 : f32
    %114 = vector.broadcast %cst_68 : f32 to vector<64x40xf32>
    %115 = arith.mulf %111, %114 : vector<64x40xf32>
    %116 = math.erf %115 : vector<64x40xf32>
    %cst_69 = arith.constant 1.000000e+00 : f32
    %117 = vector.broadcast %cst_69 : f32 to vector<64x40xf32>
    %118 = arith.addf %117, %116 : vector<64x40xf32>
    %119 = arith.mulf %113, %118 : vector<64x40xf32>
    %120 = arith.addf %104, %119 : vector<64x40xf32>
    %c1_70 = arith.constant 1 : index
    %c0_71 = arith.constant 0 : index
    %c0_72 = arith.constant 0 : index
    %121 = vector.load %arg6[%c1_70, %c0_71, %c0_72] : memref<4x40x40xf32, #tpu.memory_space<vmem>>, vector<1x40x40xf32>
    %122 = vector.shape_cast %121 : vector<1x40x40xf32> to vector<40x40xf32>
    %cst_73 = arith.constant dense<0.000000e+00> : vector<64x40xf32>
    %123 = tpu.matmul %120, %122, %cst_73 {dimension_numbers = #tpu.dot_dimension_numbers<[1], [0], [0], [1], [0, 0, 1, 1], [], []>} : vector<64x40xf32>, vector<40x40xf32>, vector<64x40xf32> -> vector<64x40xf32>
    %c1_74 = arith.constant 1 : index
    %c0_75 = arith.constant 0 : index
    %c0_76 = arith.constant 0 : index
    %124 = vector.load %arg7[%c1_74, %c0_75, %c0_76] : memref<4x1x40xf32, #tpu.memory_space<vmem>>, vector<1x1x40xf32>
    %125 = vector.shape_cast %124 : vector<1x1x40xf32> to vector<1x40xf32>
    %126 = vector.broadcast %125 : vector<1x40xf32> to vector<64x40xf32>
    %127 = arith.addf %123, %126 : vector<64x40xf32>
    %cst_77 = arith.constant 5.000000e-01 : f32
    %128 = vector.broadcast %cst_77 : f32 to vector<64x40xf32>
    %129 = arith.mulf %128, %127 : vector<64x40xf32>
    %cst_78 = arith.constant 0.707106769 : f32
    %130 = vector.broadcast %cst_78 : f32 to vector<64x40xf32>
    %131 = arith.mulf %127, %130 : vector<64x40xf32>
    %132 = math.erf %131 : vector<64x40xf32>
    %cst_79 = arith.constant 1.000000e+00 : f32
    %133 = vector.broadcast %cst_79 : f32 to vector<64x40xf32>
    %134 = arith.addf %133, %132 : vector<64x40xf32>
    %135 = arith.mulf %129, %134 : vector<64x40xf32>
    %136 = arith.addf %120, %135 : vector<64x40xf32>
    %c2_80 = arith.constant 2 : index
    %c0_81 = arith.constant 0 : index
    %c0_82 = arith.constant 0 : index
    %137 = vector.load %arg6[%c2_80, %c0_81, %c0_82] : memref<4x40x40xf32, #tpu.memory_space<vmem>>, vector<1x40x40xf32>
    %138 = vector.shape_cast %137 : vector<1x40x40xf32> to vector<40x40xf32>
    %cst_83 = arith.constant dense<0.000000e+00> : vector<64x40xf32>
    %139 = tpu.matmul %136, %138, %cst_83 {dimension_numbers = #tpu.dot_dimension_numbers<[1], [0], [0], [1], [0, 0, 1, 1], [], []>} : vector<64x40xf32>, vector<40x40xf32>, vector<64x40xf32> -> vector<64x40xf32>
    %c2_84 = arith.constant 2 : index
    %c0_85 = arith.constant 0 : index
    %c0_86 = arith.constant 0 : index
    %140 = vector.load %arg7[%c2_84, %c0_85, %c0_86] : memref<4x1x40xf32, #tpu.memory_space<vmem>>, vector<1x1x40xf32>
    %141 = vector.shape_cast %140 : vector<1x1x40xf32> to vector<1x40xf32>
    %142 = vector.broadcast %141 : vector<1x40xf32> to vector<64x40xf32>
    %143 = arith.addf %139, %142 : vector<64x40xf32>
    %cst_87 = arith.constant 5.000000e-01 : f32
    %144 = vector.broadcast %cst_87 : f32 to vector<64x40xf32>
    %145 = arith.mulf %144, %143 : vector<64x40xf32>
    %cst_88 = arith.constant 0.707106769 : f32
    %146 = vector.broadcast %cst_88 : f32 to vector<64x40xf32>
    %147 = arith.mulf %143, %146 : vector<64x40xf32>
    %148 = math.erf %147 : vector<64x40xf32>
    %cst_89 = arith.constant 1.000000e+00 : f32
    %149 = vector.broadcast %cst_89 : f32 to vector<64x40xf32>
    %150 = arith.addf %149, %148 : vector<64x40xf32>
    %151 = arith.mulf %145, %150 : vector<64x40xf32>
    %152 = arith.addf %136, %151 : vector<64x40xf32>
    %c3_90 = arith.constant 3 : index
    %c0_91 = arith.constant 0 : index
    %c0_92 = arith.constant 0 : index
    %153 = vector.load %arg6[%c3_90, %c0_91, %c0_92] : memref<4x40x40xf32, #tpu.memory_space<vmem>>, vector<1x40x40xf32>
    %154 = vector.shape_cast %153 : vector<1x40x40xf32> to vector<40x40xf32>
    %cst_93 = arith.constant dense<0.000000e+00> : vector<64x40xf32>
    %155 = tpu.matmul %152, %154, %cst_93 {dimension_numbers = #tpu.dot_dimension_numbers<[1], [0], [0], [1], [0, 0, 1, 1], [], []>} : vector<64x40xf32>, vector<40x40xf32>, vector<64x40xf32> -> vector<64x40xf32>
    %c3_94 = arith.constant 3 : index
    %c0_95 = arith.constant 0 : index
    %c0_96 = arith.constant 0 : index
    %156 = vector.load %arg7[%c3_94, %c0_95, %c0_96] : memref<4x1x40xf32, #tpu.memory_space<vmem>>, vector<1x1x40xf32>
    %157 = vector.shape_cast %156 : vector<1x1x40xf32> to vector<1x40xf32>
    %158 = vector.broadcast %157 : vector<1x40xf32> to vector<64x40xf32>
    %159 = arith.addf %155, %158 : vector<64x40xf32>
    %cst_97 = arith.constant 5.000000e-01 : f32
    %160 = vector.broadcast %cst_97 : f32 to vector<64x40xf32>
    %161 = arith.mulf %160, %159 : vector<64x40xf32>
    %cst_98 = arith.constant 0.707106769 : f32
    %162 = vector.broadcast %cst_98 : f32 to vector<64x40xf32>
    %163 = arith.mulf %159, %162 : vector<64x40xf32>
    %164 = math.erf %163 : vector<64x40xf32>
    %cst_99 = arith.constant 1.000000e+00 : f32
    %165 = vector.broadcast %cst_99 : f32 to vector<64x40xf32>
    %166 = arith.addf %165, %164 : vector<64x40xf32>
    %167 = arith.mulf %161, %166 : vector<64x40xf32>
    %168 = arith.addf %152, %167 : vector<64x40xf32>
    %cst_100 = arith.constant dense<0.000000e+00> : vector<64x4xf32>
    %169 = tpu.matmul %168, %8, %cst_100 {dimension_numbers = #tpu.dot_dimension_numbers<[1], [0], [0], [1], [0, 0, 1, 1], [], []>} : vector<64x40xf32>, vector<40x4xf32>, vector<64x4xf32> -> vector<64x4xf32>
    %170 = vector.broadcast %9 : vector<1x4xf32> to vector<64x4xf32>
    %171 = arith.addf %169, %170 : vector<64x4xf32>
    %172 = arith.addf %87, %171 : vector<64x4xf32>
    %cst_101 = arith.constant 0.0707106814 : f32
    %173 = vector.broadcast %cst_101 : f32 to vector<64x4xf32>
    %174 = arith.mulf %173, %172 : vector<64x4xf32>
    %cst_102 = arith.constant 2.000000e+00 : f32
    %175 = vector.broadcast %cst_102 : f32 to vector<64x4xf32>
    %176 = arith.mulf %175, %5 : vector<64x4xf32>
    %177 = arith.subf %174, %176 : vector<64x4xf32>
    %178 = arith.mulf %174, %177 : vector<64x4xf32>
    %cst_103 = arith.constant dense<0.000000e+00> : vector<64xf32>
    %179 = vector.multi_reduction <add>, %178, %cst_103 [1] : vector<64x4xf32> to vector<64xf32>
    %180 = vector.shape_cast %179 : vector<64xf32> to vector<64x1xf32>
    %cst_104 = arith.constant -5.000000e-01 : f32
    %181 = vector.broadcast %cst_104 : f32 to vector<64x1xf32>
    %182 = arith.mulf %181, %180 : vector<64x1xf32>
    %c0_105 = arith.constant 0 : index
    %c0_106 = arith.constant 0 : index
    %183 = vector.load %arg12[%c0_105, %c0_106] : memref<64x4xf32, #tpu.memory_space<vmem>>, vector<64x4xf32>
    tpu.vector_store %arg12[%c0_105, %c0_106], %93 {strides = array<i32>} : memref<64x4xf32, #tpu.memory_space<vmem>>, vector<64x4xf32>,
    %c0_107 = arith.constant 0 : index
    %c0_108 = arith.constant 0 : index
    %c0_109 = arith.constant 0 : index
    %184 = vector.load %arg10[%c0_107, %c0_108, %c0_109] : memref<1x64x4xf32, #tpu.memory_space<vmem>>, vector<1x64x4xf32>
    %185 = vector.shape_cast %184 : vector<1x64x4xf32> to vector<64x4xf32>
    %186 = vector.shape_cast %93 : vector<64x4xf32> to vector<1x64x4xf32>
    tpu.vector_store %arg10[%c0_107, %c0_108, %c0_109], %186 {strides = array<i32>} : memref<1x64x4xf32, #tpu.memory_space<vmem>>, vector<1x64x4xf32>,
    %c0_110 = arith.constant 0 : index
    %c0_111 = arith.constant 0 : index
    %c0_112 = arith.constant 0 : index
    %187 = vector.load %arg11[%c0_110, %c0_111, %c0_112] : memref<1x64x1xf32, #tpu.memory_space<vmem>>, vector<1x64x1xf32>
    %188 = vector.shape_cast %187 : vector<1x64x1xf32> to vector<64x1xf32>
    %189 = vector.shape_cast %182 : vector<64x1xf32> to vector<1x64x1xf32>
    tpu.vector_store %arg11[%c0_110, %c0_111, %c0_112], %189 {strides = array<i32>} : memref<1x64x1xf32, #tpu.memory_space<vmem>>, vector<1x64x1xf32>,
    return
  }
  func.func @transform_0(%arg0: i32, %arg1: i32) -> (i32, i32) {
    %c0_i32 = arith.constant 0 : i32
    %c0_i32_0 = arith.constant 0 : i32
    return %arg0, %c0_i32 : i32, i32
  }
  func.func @transform_1(%arg0: i32, %arg1: i32) -> (i32, i32, i32) {
    %c0_i32 = arith.constant 0 : i32
    %c0_i32_0 = arith.constant 0 : i32
    return %arg1, %arg0, %c0_i32 : i32, i32, i32
  }
  func.func @transform_2(%arg0: i32, %arg1: i32) -> (i32, i32) {
    %c0_i32 = arith.constant 0 : i32
    %c0_i32_0 = arith.constant 0 : i32
    %c0_i32_1 = arith.constant 0 : i32
    return %c0_i32, %c0_i32_0 : i32, i32
  }
  func.func @transform_3(%arg0: i32, %arg1: i32) -> (i32, i32) {
    %c0_i32 = arith.constant 0 : i32
    %c0_i32_0 = arith.constant 0 : i32
    %c0_i32_1 = arith.constant 0 : i32
    return %c0_i32, %c0_i32_0 : i32, i32
  }
  func.func @transform_4(%arg0: i32, %arg1: i32) -> (i32, i32, i32) {
    %c0_i32 = arith.constant 0 : i32
    %c0_i32_0 = arith.constant 0 : i32
    %c0_i32_1 = arith.constant 0 : i32
    %c0_i32_2 = arith.constant 0 : i32
    return %c0_i32, %c0_i32_0, %c0_i32_1 : i32, i32, i32
  }
  func.func @transform_5(%arg0: i32, %arg1: i32) -> (i32, i32, i32) {
    %c0_i32 = arith.constant 0 : i32
    %c0_i32_0 = arith.constant 0 : i32
    %c0_i32_1 = arith.constant 0 : i32
    %c0_i32_2 = arith.constant 0 : i32
    return %c0_i32, %c0_i32_0, %c0_i32_1 : i32, i32, i32
  }
  func.func @transform_6(%arg0: i32, %arg1: i32) -> (i32, i32) {
    %c0_i32 = arith.constant 0 : i32
    %c0_i32_0 = arith.constant 0 : i32
    %c0_i32_1 = arith.constant 0 : i32
    return %c0_i32, %c0_i32_0 : i32, i32
  }
  func.func @transform_7(%arg0: i32, %arg1: i32) -> (i32, i32) {
    %c0_i32 = arith.constant 0 : i32
    %c0_i32_0 = arith.constant 0 : i32
    %c0_i32_1 = arith.constant 0 : i32
    return %c0_i32, %c0_i32_0 : i32, i32
  }
  func.func @transform_8(%arg0: i32, %arg1: i32) -> (i32, i32, i32) {
    %c0_i32 = arith.constant 0 : i32
    %c0_i32_0 = arith.constant 0 : i32
    return %arg1, %arg0, %c0_i32 : i32, i32, i32
  }
  func.func @transform_9(%arg0: i32, %arg1: i32) -> (i32, i32, i32) {
    %c0_i32 = arith.constant 0 : i32
    %c0_i32_0 = arith.constant 0 : i32
    return %arg1, %arg0, %c0_i32 : i32, i32, i32
  }
}

</mosaic_0001>

<bundles_post_ra>
// kernel: langevin_trajectory_pallas.1
= control target key start
LH: loop header
LB: loop body
LE: loop exit
PB: predicated region body
PF: predicated region fallthrough
CT: control target
= control target key end

     0   :  { %s3687_s30 = smov 0   ;;  %s3689_s10 = smov 0   ;;  %s4497_s0 = inlined_call_operand.vmem [shape: f32[128,4], index: 0, kind: input, shape index: {}]   ;;  %s4498_s1 = inlined_call_operand.vmem [shape: f32[8,128,4], index: 1, kind: input, shape index: {}]   ;;  %s4499_s2 = inlined_call_operand.vmem [shape: f32[4,40], index: 2, kind: input, shape index: {}]   ;;  %s4500_s3 = inlined_call_operand.vmem [shape: f32[1,40], index: 3, kind: input, shape index: {}]   ;;  %s4501_s4 = inlined_call_operand.vmem [shape: f32[4,40,40], index: 4, kind: input, shape index: {}]   ;;  %s4502_s5 = inlined_call_operand.vmem [shape: f32[4,1,40], index: 5, kind: input, shape index: {}]   ;;  %s4503_s6 = inlined_call_operand.vmem [shape: f32[40,4], index: 6, kind: input, shape index: {}]   ;;  %s4504_s7 = inlined_call_operand.vmem [shape: f32[1,4], index: 7, kind: input, shape index: {}]   ;;  %s4505_s8 = inlined_call_operand.vmem [shape: f32[8,128,4], index: 8, kind: output, shape index: {0}]   ;;  %s4506_s9 = inlined_call_operand.vmem [shape: f32[8,128,1], index: 9, kind: output, shape index: {1}]  }
   0x1   :  { %s3691_s11 = smov 0   ;;  %s3693_s12 = smov 0  }
   0x2   :  { %s3695_s13 = smov 0  }
   0x3 LB: > { %s29_s14 = sadd.s32 1, %s3627_s11  ;;  %s32_s15 = sadd.s32 1, %s3631_s12  ;;  %s3635_s13 = sphi %s3695_s13, %s20_s13   ;;  %s3631_s12 = sphi %s3693_s12, %s4514_s12   ;;  %s3627_s11 = sphi %s3691_s11, %s4513_s11   ;;  %s3623_s10 = sphi %s3689_s10, %s4512_s10   ;;  %s3619_s30 = sphi %s3687_s30, %s4511_s30  }
   0x4   : > { %p30_p0 = scmp.ge.s32.totalorder %s29_s14, 8  ;;  %p2832_p1 = scmp.ge.s32.totalorder %s3635_s13, 1 }
   0x5   : > { %p324_p2 = scmp.lt.s32.totalorder %s3635_s13, 17 }
   0x6   : > { %s4516_s14 = smov (%p30_p0, %s29_s14), 0  ;;  %s4518_s15 = smov (!%p30_p0, %s32_s15), %s3631_s12 }
   0x7   : > { %4507 = sst [smem:[#allocation3_spill]] %s4516_s14  ;;  %p325_p3 = pnand %p2832_p1, %p324_p2 }
   0x8   : > { %p34_p4 = scmp.ge.s32.totalorder %s4518_s15, 2  ;;  %s2833_s16 = sshll.u32 (!%p325_p3), %s3623_s10, 3 }
   0x9   : > { %328 = sbr.rel (%p325_p3) target bundleno = 2796 (0xaec), region = 52  ;;  %p389_p5 = scmp.lt.s32.totalorder (!%p325_p3), %s3619_s30, 7 }
   0xa   : > { %s4520_s15 = smov (%p34_p4, %s4518_s15), 0  ;;  %p383_p6 = scmp.lt.s32.totalorder (!%p325_p3), %s2833_s16, 15 }
   0xb   : > { %4508 = sst [smem:[#allocation4_spill]] %s4520_s15  ;;  %p2844_p7 = scmp.ne.s32.totalorder (!%p325_p3), %s3619_s30, 0 }
   0xe   : > { %s390_s17 = scalar_select %p389_p5, %s3619_s30, 7 }
   0xf   : > { %s4522_s16 = smov (!%p383_p6, %s2833_s16), 15 }
  0x10   : > { %s2836_s18 = sshll.u32 %s390_s17, 4  ;;  %s2834_s19 = sshll.u32 %s4522_s16, 3 }
  0x11   : > { %s394_s20 = sadd.s32 %s2836_s18, %s4522_s16  ;;  %s386_s23 = scalar_lea.vmem %s4497_s0, %s2834_s19 }
  0x12   : > { %s2837_s24 = sshll.u32 %s394_s20, 3  ;;  %421 = sbr.rel (%p2844_p7) target bundleno = 28 (0x1c), region = 56 }
  0x13   : > { %s3727_s27 = scalar_lea.vmem %s4498_s1, %s2837_s24  ;;  %s3732_s10 = scalar_lea.vmem %s4505_s8, %s2837_s24 }
  0x14   : > { %s3737_s17 = scalar_lea.vmem %s4506_s9, %s2837_s24 }
  0x17   : > { %v422_v0 = vld [vmem:[%s386_s23] sm:$0xff]  ;;  %vm430_vm0 = vcmask 31744   ;;  %v423_v1 = vld [vmem:[%s386_s23 + $0x8] sm:$0xff]  ;;  %v424_v2 = vld [vmem:[%s386_s23 + $0x10] sm:$0xff] }
  0x18   : > { %431 = vst.msk [vmem:[#allocation2] sm:$0xff] %vm430_vm0, %v422_v0  ;;  %432 = vst.msk [vmem:[#allocation2 + $0x8] sm:$0xff] %vm430_vm0, %v423_v1  ;;  %v425_v3 = vld [vmem:[%s386_s23 + $0x18] sm:$0xff]  ;;  %v426_v4 = vld [vmem:[%s386_s23 + $0x20] sm:$0xff] }
  0x19   : > { %433 = vst.msk [vmem:[#allocation2 + $0x10] sm:$0xff] %vm430_vm0, %v424_v2  ;;  %v427_v5 = vld [vmem:[%s386_s23 + $0x28] sm:$0xff]  ;;  %434 = vst.msk [vmem:[#allocation2 + $0x18] sm:$0xff] %vm430_vm0, %v425_v3  ;;  %v428_v6 = vld [vmem:[%s386_s23 + $0x30] sm:$0xff] }
  0x1a   : > { %435 = vst.msk [vmem:[#allocation2 + $0x20] sm:$0xff] %vm430_vm0, %v426_v4  ;;  %436 = vst.msk [vmem:[#allocation2 + $0x28] sm:$0xff] %vm430_vm0, %v427_v5  ;;  %v429_v7 = vld [vmem:[%s386_s23 + $0x38] sm:$0xff] }
  0x1b   : > { %437 = vst.msk [vmem:[#allocation2 + $0x30] sm:$0xff] %vm430_vm0, %v428_v6  ;;  %438 = vst.msk [vmem:[#allocation2 + $0x38] sm:$0xff] %vm430_vm0, %v429_v7 }
  0x1c PF: > { %v3743_v8 = vld [vmem:[%s4499_s2] sm:$0xf]  ;;  %vm494_vm1 = vcmask 1043456   ;;  %vm469_vm2 = vcmask 31744   ;;  %v3767_v18 = vld [vmem:[%s4501_s4 + $0x18] sm:$0xff]  ;;  %v3774_v19 = vld [vmem:[%s4501_s4 + $0x10] sm:$0xff] }
  0x1d   : > { %3117 = vmatprep.subr.msk.mxu0 %vm494_vm1, %v3743_v8  ;;  %v3760_v17 = vld [vmem:[%s4501_s4 + $0x20] sm:$0xff]  ;;  %v3781_v20 = vld [vmem:[%s4501_s4 + $0x8] sm:$0xff]  ;;  %vm655_vm3 = vcmask 326656   ;;  %vm2667_vm4 = vcmask 7168  }
  0x1e   : > { %3118 = vmatpush3.msk.msra.mxu0 %vm494_vm1, %v3743_v8  ;;  %3131 = vmatprep.subr.mxu1 %v3760_v17  ;;  %v3788_v21 = vld [vmem:[%s4501_s4] sm:$0xff] }
  0x1f   : > { %v439_v9 = vld [vmem:[#allocation2] sm:$0xff]  ;;  %v440_v10 = vld [vmem:[#allocation2 + $0x8] sm:$0xff]  ;;  %3132 = vmatpush3.msra.mxu1 %v3760_v17 }
  0x20   : > { %3119 = vmatprep.mubr.msk.f32.mxu0 %vm469_vm2, %v439_v9  ;;  %v441_v11 = vld [vmem:[#allocation2 + $0x10] sm:$0xff]  ;;  %v442_v12 = vld [vmem:[#allocation2 + $0x18] sm:$0xff]  ;;  %3133 = vmatprep.subr.mxu1 %v3767_v18  ;;  %v2845_v22 = vld [vmem:[%s4500_s3] ss:$0 sm:$0xff] }
  0x21   : > { %3120 = vmatmul.mubr.msk.f32.vlgmr.msra.gmra.mxu0 %vm469_vm2, %v440_v10  ;;  %v443_v13 = vld [vmem:[#allocation2 + $0x20] sm:$0xff]  ;;  %v444_v14 = vld [vmem:[#allocation2 + $0x28] sm:$0xff]  ;;  %3134 = vmatpush3.msra.mxu1 %v3767_v18 }
  0x22   : > { %3122 = vmatprep.mubr.msk.f32.mxu0 %vm469_vm2, %v441_v11  ;;  %v445_v15 = vld [vmem:[#allocation2 + $0x30] sm:$0xff]  ;;  %v446_v16 = vld [vmem:[#allocation2 + $0x38] sm:$0xff]  ;;  %3135 = vmatprep.subr.mxu1 %v3774_v19 }
  0x23   : > { %3136 = vmatpush3.msra.mxu1 %v3774_v19 }
  0x24   : > { %3137 = vmatprep.subr.mxu1 %v3781_v20 }
  0x25   : > { %3123 = vmatmul.mubr.msk.f32.gmra.mxu0 %vm469_vm2, %v442_v12  ;;  %3138 = vmatpush3.msra.mxu1 %v3781_v20 }
  0x26   : > { %3125 = vmatprep.mubr.msk.f32.mxu0 %vm469_vm2, %v443_v13  ;;  %3139 = vmatprep.subr.mxu1 %v3788_v21 }
  0x27   : > { %3140 = vmatpush3.msra.mxu1 %v3788_v21 }
  0x29   : > { %3126 = vmatmul.mubr.msk.f32.gmra.mxu0 %vm469_vm2, %v444_v14 }
  0x2a   : > { %3128 = vmatprep.mubr.msk.f32.mxu0 %vm469_vm2, %v445_v15 }
  0x2d   : > { %3129 = vmatmul.mubr.msk.f32.gmra.mxu0 %vm469_vm2, %v446_v16  ;;  %v3830_v16 = vld [vmem:[%s4501_s4 + $0x48] sm:$0xff] }
  0x2e   : > { %3153 = vmatprep.subr.mxu0 %v3830_v16 }
  0x2f   : > { %3154 = vmatpush3.msra.mxu0 %v3830_v16 }
  0xe1   : > { %v3121_v23 = vpop.f32.mrf.mxu0 }
  0xe2   : > { %v570_v24 = vadd.f32 %v3121_v23, %v2845_v22  ;;  %v3844_v23 = vld [vmem:[%s4501_s4 + $0x38] sm:$0xff] }
  0xe3   : > { %v564_v25 = vpop.f32.mrf.mxu0 }
  0xe4   : > { %v612_v26 = vmul.f32 0.70710677, %v570_v24  ;;  %v565_v27 = vadd.f32 %v2845_v22, %v564_v25  ;;  %v604_v53 = vmul.f32 0.5, %v570_v24  ;;  %v3851_v24 = vld [vmem:[%s4501_s4 + $0x30] sm:$0xff]  ;;  %v3858_v25 = vld [vmem:[%s4501_s4 + $0x28] sm:$0xff] }
  0xe5   : > { %v3124_v28 = vpop.f32.mrf.mxu0 }
  0xe6   : > { %3415 = verf.f32 %v612_v26  ;;  %v611_v29 = vmul.f32 0.70710677, %v565_v27  ;;  %v580_v30 = vadd.f32 %v3124_v28, %v2845_v22  ;;  %v603_v50 = vmul.f32 0.5, %v565_v27  ;;  %v2855_v26 = vld [vmem:[%s4502_s5] ss:$0 sm:$0xff] }
  0xe7   : > { %v574_v31 = vpop.f32.mrf.mxu0 }
  0xe8   : > { %3417 = verf.f32 %v611_v29  ;;  %v614_v32 = vmul.f32 0.70710677, %v580_v30  ;;  %v575_v33 = vadd.f32 %v2845_v22, %v574_v31  ;;  %v606_v61 = vmul.f32 0.5, %v580_v30 }
  0xe9   : > { %v3127_v34 = vpop.f32.mrf.mxu0 }
  0xea   : > { %3419 = verf.f32 %v614_v32  ;;  %v613_v35 = vmul.f32 0.70710677, %v575_v33  ;;  %v590_v36 = vadd.f32 %v3127_v34, %v2845_v22  ;;  %v605_v58 = vmul.f32 0.5, %v575_v33 }
  0xeb   : > { %v584_v37 = vpop.f32.mrf.mxu0 }
  0xec   : > { %3421 = verf.f32 %v613_v35  ;;  %v616_v38 = vmul.f32 0.70710677, %v590_v36  ;;  %v585_v39 = vadd.f32 %v2845_v22, %v584_v37  ;;  %v608_v5 = vmul.f32 0.5, %v590_v36 }
  0xed   : > { %v3130_v40 = vpop.f32.mrf.mxu0 }
  0xee   : > { %3423 = verf.f32 %v616_v38  ;;  %v615_v41 = vmul.f32 0.70710677, %v585_v39  ;;  %v600_v42 = vadd.f32 %v3130_v40, %v2845_v22  ;;  %v607_v2 = vmul.f32 0.5, %v585_v39 }
  0xef   : > { %v594_v43 = vpop.f32.mrf.mxu0 }
  0xf0   : > { %3425 = verf.f32 %v615_v41  ;;  %v618_v44 = vmul.f32 0.70710677, %v600_v42  ;;  %v595_v45 = vadd.f32 %v2845_v22, %v594_v43  ;;  %v610_v13 = vmul.f32 0.5, %v600_v42  ;;  %v3837_v22 = vld [vmem:[%s4501_s4 + $0x40] sm:$0xff] }
  0xf1   : > { %3155 = vmatprep.subr.mxu0 %v3837_v22 }
  0xf2   : > { %3427 = verf.f32 %v618_v44  ;;  %v617_v46 = vmul.f32 0.70710677, %v595_v45  ;;  %v609_v11 = vmul.f32 0.5, %v595_v45  ;;  %3156 = vmatpush3.msra.mxu0 %v3837_v22 }
  0xf3   : > { %v3416_v47 = vpop.eup %3415  ;;  %3157 = vmatprep.subr.mxu0 %v3844_v23 }
  0xf4   : > { %3429 = verf.f32 %v617_v46  ;;  %v628_v49 = vadd.f32 1.0, %v3416_v47  ;;  %3158 = vmatpush3.msra.mxu0 %v3844_v23 }
  0xf5   : > { %v3418_v48 = vpop.eup %3417  ;;  %3159 = vmatprep.subr.mxu0 %v3851_v24 }
  0xf6   : > { %v627_v51 = vadd.f32 1.0, %v3418_v48  ;;  %v3797_v56 = vmul.f32 %v628_v49, %v604_v53  ;;  %3160 = vmatpush3.msra.mxu0 %v3851_v24 }
  0xf7   : > { %v3420_v52 = vpop.eup %3419  ;;  %3161 = vmatprep.subr.mxu0 %v3858_v25 }
  0xf8   : > { %v3795_v54 = vmul.f32 %v627_v51, %v603_v50  ;;  %v630_v57 = vadd.f32 1.0, %v3420_v52  ;;  %3162 = vmatpush3.msra.mxu0 %v3858_v25 }
  0xf9   : > { %v3422_v55 = vpop.eup %3421 }
  0xfa   : > { %v629_v59 = vadd.f32 1.0, %v3422_v55  ;;  %3141 = vmatprep.mubr.msk.f32.mxu1 %vm655_vm3, %v3795_v54  ;;  %v3805_v0 = vmul.f32 %v630_v57, %v606_v61 }
  0xfb   : > { %v3424_v60 = vpop.eup %3423  ;;  %3142 = vmatmul.mubr.msk.f32.vlgmr.msra.gmra.mxu1 %vm655_vm3, %v3797_v56 }
  0xfc   : > { %v3803_v62 = vmul.f32 %v629_v59, %v605_v58  ;;  %v632_v1 = vadd.f32 1.0, %v3424_v60 }
  0xfd   : > { %v3426_v63 = vpop.eup %3425 }
  0xfe   : > { %v631_v3 = vadd.f32 1.0, %v3426_v63  ;;  %3144 = vmatprep.mubr.msk.f32.mxu1 %vm655_vm3, %v3803_v62  ;;  %v3813_v9 = vmul.f32 %v632_v1, %v608_v5 }
  0xff   : > { %v3428_v4 = vpop.eup %3427  ;;  %3145 = vmatmul.mubr.msk.f32.gmra.mxu1 %vm655_vm3, %v3805_v0 }
 0x100   : > { %v3811_v6 = vmul.f32 %v631_v3, %v607_v2  ;;  %v634_v10 = vadd.f32 1.0, %v3428_v4 }
 0x101   : > { %v3430_v7 = vpop.eup %3429 }
 0x102   : > { %v633_v12 = vadd.f32 1.0, %v3430_v7  ;;  %3147 = vmatprep.mubr.msk.f32.mxu1 %vm655_vm3, %v3811_v6  ;;  %v3821_v15 = vmul.f32 %v634_v10, %v610_v13 }
 0x103   : > { %3148 = vmatmul.mubr.msk.f32.gmra.mxu1 %vm655_vm3, %v3813_v9 }
 0x104   : > { %v3819_v14 = vmul.f32 %v633_v12, %v609_v11 }
 0x106   : > { %3150 = vmatprep.mubr.msk.f32.mxu1 %vm655_vm3, %v3819_v14 }
 0x107   : > { %3151 = vmatmul.mubr.msk.f32.gmra.mxu1 %vm655_vm3, %v3821_v15 }
 0x1bb   : > { %v3143_v27 = vpop.f32.mrf.mxu1 }
 0x1bc   : > { %v752_v28 = vadd.f32 %v3143_v27, %v2855_v26 }
 0x1bd   : > { %v746_v29 = vpop.f32.mrf.mxu1 }
 0x1be   : > { %v794_v30 = vmul.f32 0.70710677, %v752_v28  ;;  %v747_v31 = vadd.f32 %v2855_v26, %v746_v29  ;;  %v786_v55 = vmul.f32 0.5, %v752_v28 }
 0x1bf   : > { %v3146_v32 = vpop.f32.mrf.mxu1 }
 0x1c0   : > { %3431 = verf.f32 %v794_v30  ;;  %v793_v33 = vmul.f32 0.70710677, %v747_v31  ;;  %v762_v34 = vadd.f32 %v3146_v32, %v2855_v26  ;;  %v785_v57 = vmul.f32 0.5, %v747_v31 }
 0x1c1   : > { %v756_v35 = vpop.f32.mrf.mxu1 }
 0x1c2   : > { %3433 = verf.f32 %v793_v33  ;;  %v796_v36 = vmul.f32 0.70710677, %v762_v34  ;;  %v757_v37 = vadd.f32 %v2855_v26, %v756_v35  ;;  %v788_v2 = vmul.f32 0.5, %v762_v34 }
 0x1c3   : > { %v3149_v38 = vpop.f32.mrf.mxu1 }
 0x1c4   : > { %3435 = verf.f32 %v796_v36  ;;  %v795_v39 = vmul.f32 0.70710677, %v757_v37  ;;  %v772_v40 = vadd.f32 %v3149_v38, %v2855_v26  ;;  %v787_v4 = vmul.f32 0.5, %v757_v37 }
 0x1c5   : > { %v766_v41 = vpop.f32.mrf.mxu1 }
 0x1c6   : > { %3437 = verf.f32 %v795_v39  ;;  %v798_v42 = vmul.f32 0.70710677, %v772_v40  ;;  %v767_v43 = vadd.f32 %v2855_v26, %v766_v41  ;;  %v790_v27 = vmul.f32 0.5, %v772_v40 }
 0x1c7   : > { %v3152_v44 = vpop.f32.mrf.mxu1 }
 0x1c8   : > { %3439 = verf.f32 %v798_v42  ;;  %v797_v45 = vmul.f32 0.70710677, %v767_v43  ;;  %v782_v46 = vadd.f32 %v3152_v44, %v2855_v26  ;;  %v789_v28 = vmul.f32 0.5, %v767_v43  ;;  %v3936_v42 = vld [vmem:[%s4501_s4 + $0x50] sm:$0xff]  ;;  %v2870_v43 = vld [vmem:[%s4502_s5 + $0x1] ss:$0 sm:$0xff] }
 0x1c9   : > { %v776_v47 = vpop.f32.mrf.mxu1 }
 0x1ca   : > { %3441 = verf.f32 %v797_v45  ;;  %v800_v48 = vmul.f32 0.70710677, %v782_v46  ;;  %v777_v49 = vadd.f32 %v2855_v26, %v776_v47  ;;  %v792_v35 = vmul.f32 0.5, %v782_v46 }
 0x1cc   : > { %3443 = verf.f32 %v800_v48  ;;  %v799_v50 = vmul.f32 0.70710677, %v777_v49  ;;  %v791_v36 = vmul.f32 0.5, %v777_v49 }
 0x1cd   : > { %v3432_v51 = vpop.eup %3431 }
 0x1ce   : > { %v810_v52 = vadd.f32 1.0, %v3432_v51  ;;  %3445 = verf.f32 %v799_v50 }
 0x1cf   : > { %v3434_v53 = vpop.eup %3433 }
 0x1d0   : > { %v809_v58 = vadd.f32 1.0, %v3434_v53  ;;  %v818_v60 = vmul.f32 %v810_v52, %v786_v55 }
 0x1d1   : > { %v3436_v59 = vpop.eup %3435 }
 0x1d2   : > { %v817_v61 = vmul.f32 %v809_v58, %v785_v57  ;;  %v812_v63 = vadd.f32 1.0, %v3436_v59  ;;  %v3869_v10 = vadd.f32 %v818_v60, %v3797_v56 }
 0x1d3   : > { %v3438_v1 = vpop.eup %3437 }
 0x1d4   : > { %v3866_v3 = vadd.f32 %v817_v61, %v3795_v54  ;;  %v811_v5 = vadd.f32 1.0, %v3438_v1  ;;  %v820_v11 = vmul.f32 %v812_v63, %v788_v2 }
 0x1d5   : > { %v3440_v7 = vpop.eup %3439 }
 0x1d6   : > { %v819_v12 = vmul.f32 %v811_v5, %v787_v4  ;;  %v814_v13 = vadd.f32 1.0, %v3440_v7  ;;  %3163 = vmatprep.mubr.msk.f32.mxu0 %vm655_vm3, %v3866_v3  ;;  %v3879_v56 = vadd.f32 %v820_v11, %v3805_v0 }
 0x1d7   : > { %v3442_v26 = vpop.eup %3441  ;;  %3164 = vmatmul.mubr.msk.f32.vlgmr.msra.gmra.mxu0 %vm655_vm3, %v3869_v10 }
 0x1d8   : > { %v3876_v54 = vadd.f32 %v819_v12, %v3803_v62  ;;  %v813_v29 = vadd.f32 1.0, %v3442_v26  ;;  %v822_v31 = vmul.f32 %v814_v13, %v790_v27 }
 0x1d9   : > { %v3444_v30 = vpop.eup %3443 }
 0x1da   : > { %v821_v32 = vmul.f32 %v813_v29, %v789_v28  ;;  %v816_v33 = vadd.f32 1.0, %v3444_v30  ;;  %3166 = vmatprep.mubr.msk.f32.mxu0 %vm655_vm3, %v3876_v54  ;;  %v3889_v38 = vadd.f32 %v822_v31, %v3813_v9  ;;  %v3915_v9 = vld [vmem:[%s4501_s4 + $0x68] sm:$0xff] }
 0x1db   : > { %v3446_v34 = vpop.eup %3445  ;;  %3167 = vmatmul.mubr.msk.f32.gmra.mxu0 %vm655_vm3, %v3879_v56 }
 0x1dc   : > { %v3886_v62 = vadd.f32 %v821_v32, %v3811_v6  ;;  %v815_v37 = vadd.f32 1.0, %v3446_v34  ;;  %v824_v0 = vmul.f32 %v816_v33, %v792_v35  ;;  %v3908_v6 = vld [vmem:[%s4501_s4 + $0x70] sm:$0xff] }
 0x1dd   : > { %3175 = vmatprep.subr.mxu1 %v3908_v6 }
 0x1de   : > { %v823_v39 = vmul.f32 %v815_v37, %v791_v36  ;;  %3169 = vmatprep.mubr.msk.f32.mxu0 %vm655_vm3, %v3886_v62  ;;  %v3899_v41 = vadd.f32 %v824_v0, %v3821_v15  ;;  %3176 = vmatpush3.msra.mxu1 %v3908_v6  ;;  %v3929_v15 = vld [vmem:[%s4501_s4 + $0x58] sm:$0xff] }
 0x1df   : > { %3170 = vmatmul.mubr.msk.f32.gmra.mxu0 %vm655_vm3, %v3889_v38  ;;  %3177 = vmatprep.subr.mxu1 %v3915_v9 }
 0x1e0   : > { %v3896_v40 = vadd.f32 %v823_v39, %v3819_v14  ;;  %3178 = vmatpush3.msra.mxu1 %v3915_v9  ;;  %v3922_v14 = vld [vmem:[%s4501_s4 + $0x60] sm:$0xff] }
 0x1e1   : > { %3179 = vmatprep.subr.mxu1 %v3922_v14 }
 0x1e2   : > { %3172 = vmatprep.mubr.msk.f32.mxu0 %vm655_vm3, %v3896_v40  ;;  %3180 = vmatpush3.msra.mxu1 %v3922_v14 }
 0x1e3   : > { %3173 = vmatmul.mubr.msk.f32.gmra.mxu0 %vm655_vm3, %v3899_v41  ;;  %3181 = vmatprep.subr.mxu1 %v3929_v15 }
 0x1e4   : > { %3182 = vmatpush3.msra.mxu1 %v3929_v15 }
 0x1e5   : > { %3183 = vmatprep.subr.mxu1 %v3936_v42 }
 0x1e6   : > { %3184 = vmatpush3.msra.mxu1 %v3936_v42 }
 0x297   : > { %v3165_v44 = vpop.f32.mrf.mxu0 }
 0x298   : > { %v943_v45 = vadd.f32 %v3165_v44, %v2870_v43 }
 0x299   : > { %v937_v46 = vpop.f32.mrf.mxu0 }
 0x29a   : > { %v985_v47 = vmul.f32 0.70710677, %v943_v45  ;;  %v938_v48 = vadd.f32 %v2870_v43, %v937_v46  ;;  %v977_v28 = vmul.f32 0.5, %v943_v45 }
 0x29b   : > { %v3168_v49 = vpop.f32.mrf.mxu0 }
 0x29c   : > { %3447 = verf.f32 %v985_v47  ;;  %v984_v50 = vmul.f32 0.70710677, %v938_v48  ;;  %v953_v51 = vadd.f32 %v3168_v49, %v2870_v43  ;;  %v976_v29 = vmul.f32 0.5, %v938_v48 }
 0x29d   : > { %v947_v52 = vpop.f32.mrf.mxu0 }
 0x29e   : > { %3449 = verf.f32 %v984_v50  ;;  %v987_v53 = vmul.f32 0.70710677, %v953_v51  ;;  %v948_v55 = vadd.f32 %v2870_v43, %v947_v52  ;;  %v979_v36 = vmul.f32 0.5, %v953_v51 }
 0x29f   : > { %v3171_v57 = vpop.f32.mrf.mxu0 }
 0x2a0   : > { %3451 = verf.f32 %v987_v53  ;;  %v986_v58 = vmul.f32 0.70710677, %v948_v55  ;;  %v963_v59 = vadd.f32 %v3171_v57, %v2870_v43  ;;  %v978_v0 = vmul.f32 0.5, %v948_v55 }
 0x2a1   : > { %v957_v60 = vpop.f32.mrf.mxu0 }
 0x2a2   : > { %3453 = verf.f32 %v986_v58  ;;  %v989_v61 = vmul.f32 0.70710677, %v963_v59  ;;  %v958_v63 = vadd.f32 %v2870_v43, %v957_v60  ;;  %v981_v49 = vmul.f32 0.5, %v963_v59 }
 0x2a3   : > { %v3174_v1 = vpop.f32.mrf.mxu0 }
 0x2a4   : > { %3455 = verf.f32 %v989_v61  ;;  %v988_v2 = vmul.f32 0.70710677, %v958_v63  ;;  %v973_v4 = vadd.f32 %v3174_v1, %v2870_v43  ;;  %v980_v50 = vmul.f32 0.5, %v958_v63 }
 0x2a5   : > { %v967_v5 = vpop.f32.mrf.mxu0 }
 0x2a6   : > { %3457 = verf.f32 %v988_v2  ;;  %v991_v7 = vmul.f32 0.70710677, %v973_v4  ;;  %v968_v11 = vadd.f32 %v2870_v43, %v967_v5  ;;  %v983_v59 = vmul.f32 0.5, %v973_v4  ;;  %v4014_v5 = vld [vmem:[%s4501_s4 + $0x78] sm:$0xff] }
 0x2a8   : > { %3459 = verf.f32 %v991_v7  ;;  %v990_v12 = vmul.f32 0.70710677, %v968_v11  ;;  %v982_v60 = vmul.f32 0.5, %v968_v11  ;;  %v2885_v7 = vld [vmem:[%s4502_s5 + $0x2] ss:$0 sm:$0xff] }
 0x2a9   : > { %v3448_v13 = vpop.eup %3447 }
 0x2aa   : > { %v1001_v26 = vadd.f32 1.0, %v3448_v13  ;;  %3461 = verf.f32 %v990_v12 }
 0x2ab   : > { %v3450_v27 = vpop.eup %3449 }
 0x2ac   : > { %v1000_v30 = vadd.f32 1.0, %v3450_v27  ;;  %v1009_v32 = vmul.f32 %v1001_v26, %v977_v28 }
 0x2ad   : > { %v3452_v31 = vpop.eup %3451 }
 0x2ae   : > { %v1008_v33 = vmul.f32 %v1000_v30, %v976_v29  ;;  %v1003_v34 = vadd.f32 1.0, %v3452_v31  ;;  %v3947_v44 = vadd.f32 %v1009_v32, %v3869_v10 }
 0x2af   : > { %v3454_v35 = vpop.eup %3453 }
 0x2b0   : > { %v3944_v37 = vadd.f32 %v1008_v33, %v3866_v3  ;;  %v1002_v39 = vadd.f32 1.0, %v3454_v35  ;;  %v1011_v46 = vmul.f32 %v1003_v34, %v979_v36 }
 0x2b1   : > { %v3456_v43 = vpop.eup %3455 }
 0x2b2   : > { %v1010_v47 = vmul.f32 %v1002_v39, %v978_v0  ;;  %v1005_v45 = vadd.f32 1.0, %v3456_v43  ;;  %3185 = vmatprep.mubr.msk.f32.mxu1 %vm655_vm3, %v3944_v37  ;;  %v3957_v10 = vadd.f32 %v1011_v46, %v3879_v56 }
 0x2b3   : > { %v3458_v48 = vpop.eup %3457  ;;  %3186 = vmatmul.mubr.msk.f32.vlgmr.msra.gmra.mxu1 %vm655_vm3, %v3947_v44 }
 0x2b4   : > { %v3954_v3 = vadd.f32 %v1010_v47, %v3876_v54  ;;  %v1004_v51 = vadd.f32 1.0, %v3458_v48  ;;  %v1013_v53 = vmul.f32 %v1005_v45, %v981_v49 }
 0x2b5   : > { %v3460_v52 = vpop.eup %3459 }
 0x2b6   : > { %v1012_v55 = vmul.f32 %v1004_v51, %v980_v50  ;;  %v1007_v57 = vadd.f32 1.0, %v3460_v52  ;;  %3188 = vmatprep.mubr.msk.f32.mxu1 %vm655_vm3, %v3954_v3  ;;  %v3967_v63 = vadd.f32 %v1013_v53, %v3889_v38  ;;  %v3993_v38 = vld [vmem:[%s4501_s4 + $0x90] sm:$0xff] }
 0x2b7   : > { %v3462_v58 = vpop.eup %3461  ;;  %3189 = vmatmul.mubr.msk.f32.gmra.mxu1 %vm655_vm3, %v3957_v10 }
 0x2b8   : > { %v3964_v54 = vadd.f32 %v1012_v55, %v3886_v62  ;;  %v1006_v61 = vadd.f32 1.0, %v3462_v58  ;;  %v1015_v56 = vmul.f32 %v1007_v57, %v983_v59  ;;  %v3986_v62 = vld [vmem:[%s4501_s4 + $0x98] sm:$0xff] }
 0x2b9   : > { %3197 = vmatprep.subr.mxu0 %v3986_v62 }
 0x2ba   : > { %v1014_v1 = vmul.f32 %v1006_v61, %v982_v60  ;;  %3191 = vmatprep.mubr.msk.f32.mxu1 %vm655_vm3, %v3964_v54  ;;  %v3977_v4 = vadd.f32 %v1015_v56, %v3899_v41  ;;  %3198 = vmatpush3.msra.mxu0 %v3986_v62  ;;  %v4007_v41 = vld [vmem:[%s4501_s4 + $0x80] sm:$0xff] }
 0x2bb   : > { %3192 = vmatmul.mubr.msk.f32.gmra.mxu1 %vm655_vm3, %v3967_v63  ;;  %3199 = vmatprep.subr.mxu0 %v3993_v38 }
 0x2bc   : > { %v3974_v2 = vadd.f32 %v1014_v1, %v3896_v40  ;;  %3200 = vmatpush3.msra.mxu0 %v3993_v38  ;;  %v4000_v40 = vld [vmem:[%s4501_s4 + $0x88] sm:$0xff] }
 0x2bd   : > { %3201 = vmatprep.subr.mxu0 %v4000_v40 }
 0x2be   : > { %3194 = vmatprep.mubr.msk.f32.mxu1 %vm655_vm3, %v3974_v2  ;;  %3202 = vmatpush3.msra.mxu0 %v4000_v40 }
 0x2bf   : > { %3195 = vmatmul.mubr.msk.f32.gmra.mxu1 %vm655_vm3, %v3977_v4  ;;  %3203 = vmatprep.subr.mxu0 %v4007_v41 }
 0x2c0   : > { %3204 = vmatpush3.msra.mxu0 %v4007_v41 }
 0x2c1   : > { %3205 = vmatprep.subr.mxu0 %v4014_v5 }
 0x2c2   : > { %3206 = vmatpush3.msra.mxu0 %v4014_v5 }
 0x373   : > { %v3187_v11 = vpop.f32.mrf.mxu1 }
 0x374   : > { %v1134_v12 = vadd.f32 %v3187_v11, %v2885_v7 }
 0x375   : > { %v1128_v13 = vpop.f32.mrf.mxu1 }
 0x376   : > { %v1176_v26 = vmul.f32 0.70710677, %v1134_v12  ;;  %v1129_v27 = vadd.f32 %v2885_v7, %v1128_v13  ;;  %v1168_v57 = vmul.f32 0.5, %v1134_v12 }
 0x377   : > { %v3190_v28 = vpop.f32.mrf.mxu1 }
 0x378   : > { %3463 = verf.f32 %v1176_v26  ;;  %v1175_v29 = vmul.f32 0.70710677, %v1129_v27  ;;  %v1144_v30 = vadd.f32 %v3190_v28, %v2885_v7  ;;  %v1167_v58 = vmul.f32 0.5, %v1129_v27 }
 0x379   : > { %v1138_v31 = vpop.f32.mrf.mxu1 }
 0x37a   : > { %3465 = verf.f32 %v1175_v29  ;;  %v1178_v32 = vmul.f32 0.70710677, %v1144_v30  ;;  %v1139_v33 = vadd.f32 %v2885_v7, %v1138_v31  ;;  %v1170_v13 = vmul.f32 0.5, %v1144_v30 }
 0x37b   : > { %v3193_v34 = vpop.f32.mrf.mxu1 }
 0x37c   : > { %3467 = verf.f32 %v1178_v32  ;;  %v1177_v35 = vmul.f32 0.70710677, %v1139_v33  ;;  %v1154_v36 = vadd.f32 %v3193_v34, %v2885_v7  ;;  %v1169_v28 = vmul.f32 0.5, %v1139_v33 }
 0x37d   : > { %v1148_v0 = vpop.f32.mrf.mxu1 }
 0x37e   : > { %3469 = verf.f32 %v1177_v35  ;;  %v1180_v39 = vmul.f32 0.70710677, %v1154_v36  ;;  %v1149_v43 = vadd.f32 %v2885_v7, %v1148_v0  ;;  %v1172_v35 = vmul.f32 0.5, %v1154_v36 }
 0x37f   : > { %v3196_v46 = vpop.f32.mrf.mxu1 }
 0x380   : > { %3471 = verf.f32 %v1180_v39  ;;  %v1179_v47 = vmul.f32 0.70710677, %v1149_v43  ;;  %v1164_v45 = vadd.f32 %v3196_v46, %v2885_v7  ;;  %v1171_v30 = vmul.f32 0.5, %v1149_v43 }
 0x381   : > { %v1158_v48 = vpop.f32.mrf.mxu1 }
 0x382   : > { %3473 = verf.f32 %v1179_v47  ;;  %v1182_v49 = vmul.f32 0.70710677, %v1164_v45  ;;  %v1159_v50 = vadd.f32 %v2885_v7, %v1158_v48  ;;  %v1174_v36 = vmul.f32 0.5, %v1164_v45 }
 0x384   : > { %3475 = verf.f32 %v1182_v49  ;;  %v1181_v51 = vmul.f32 0.70710677, %v1159_v50  ;;  %v1173_v43 = vmul.f32 0.5, %v1159_v50  ;;  %v4099_v50 = vld [vmem:[%s4503_s6] sm:$0xff] }
 0x385   : > { %v3464_v52 = vpop.eup %3463 }
 0x386   : > { %v1192_v53 = vadd.f32 1.0, %v3464_v52  ;;  %3477 = verf.f32 %v1181_v51 }
 0x387   : > { %v3466_v55 = vpop.eup %3465 }
 0x388   : > { %v1191_v59 = vadd.f32 1.0, %v3466_v55  ;;  %v1200_v61 = vmul.f32 %v1192_v53, %v1168_v57  ;;  %v2900_v55 = vld [vmem:[%s4502_s5 + $0x3] ss:$0 sm:$0xff] }
 0x389   : > { %v3468_v60 = vpop.eup %3467 }
 0x38a   : > { %v1199_v56 = vmul.f32 %v1191_v59, %v1167_v58  ;;  %v1194_v1 = vadd.f32 1.0, %v3468_v60  ;;  %v4025_v31 = vadd.f32 %v1200_v61, %v3947_v44 }
 0x38b   : > { %v3470_v11 = vpop.eup %3469 }
 0x38c   : > { %v4022_v26 = vadd.f32 %v1199_v56, %v3944_v37  ;;  %v1193_v7 = vadd.f32 1.0, %v3470_v11  ;;  %v1202_v32 = vmul.f32 %v1194_v1, %v1170_v13 }
 0x38d   : > { %v3472_v29 = vpop.eup %3471 }
 0x38e   : > { %v1201_v34 = vmul.f32 %v1193_v7, %v1169_v28  ;;  %v1196_v12 = vadd.f32 1.0, %v3472_v29  ;;  %3207 = vmatprep.mubr.msk.f32.mxu0 %vm655_vm3, %v4022_v26  ;;  %v4035_v44 = vadd.f32 %v1202_v32, %v3957_v10 }
 0x38f   : > { %v3474_v27 = vpop.eup %3473  ;;  %3208 = vmatmul.mubr.msk.f32.vlgmr.msra.gmra.mxu0 %vm655_vm3, %v4025_v31 }
 0x390   : > { %v4032_v37 = vadd.f32 %v1201_v34, %v3954_v3  ;;  %v1195_v33 = vadd.f32 1.0, %v3474_v27  ;;  %v1204_v39 = vmul.f32 %v1196_v12, %v1172_v35 }
 0x391   : > { %v3476_v0 = vpop.eup %3475 }
 0x392   : > { %v1203_v46 = vmul.f32 %v1195_v33, %v1171_v30  ;;  %v1198_v47 = vadd.f32 1.0, %v3476_v0  ;;  %3210 = vmatprep.mubr.msk.f32.mxu0 %vm655_vm3, %v4032_v37  ;;  %v4045_v51 = vadd.f32 %v1204_v39, %v3967_v63  ;;  %v4072_v63 = vld [vmem:[%s4503_s6 + $0x18] sm:$0xff] }
 0x393   : > { %v3478_v48 = vpop.eup %3477  ;;  %3211 = vmatmul.mubr.msk.f32.gmra.mxu0 %vm655_vm3, %v4035_v44 }
 0x394   : > { %v4042_v3 = vadd.f32 %v1203_v46, %v3964_v54  ;;  %v1197_v49 = vadd.f32 1.0, %v3478_v48  ;;  %v1206_v10 = vmul.f32 %v1198_v47, %v1174_v36  ;;  %v4064_v54 = vld [vmem:[%s4503_s6 + $0x20] sm:$0xff] }
 0x395   : > { %3219 = vmatprep.subr.mxu0 %v4064_v54  ;;  %3365 = vmatprep.subr.mxu1 %v4064_v54 }
 0x396   : > { %v1205_v52 = vmul.f32 %v1197_v49, %v1173_v43  ;;  %3213 = vmatprep.mubr.msk.f32.mxu0 %vm655_vm3, %v4042_v3  ;;  %v4055_v53 = vadd.f32 %v1206_v10, %v3977_v4  ;;  %3220 = vmatpush3.msra.mxu0 %v4064_v54  ;;  %v4090_v4 = vld [vmem:[%s4503_s6 + $0x8] sm:$0xff] }
 0x397   : > { %3214 = vmatmul.mubr.msk.f32.gmra.mxu0 %vm655_vm3, %v4045_v51  ;;  %3370 = vmatpush3.msra.mxu1 %v4064_v54 }
 0x398   : > { %v4052_v45 = vadd.f32 %v1205_v52, %v3974_v2  ;;  %3221 = vmatprep.subr.mxu0 %v4072_v63  ;;  %3366 = vmatprep.subr.mxu1 %v4072_v63  ;;  %v4081_v2 = vld [vmem:[%s4503_s6 + $0x10] sm:$0xff] }
 0x399   : > { %3222 = vmatpush3.msra.mxu0 %v4072_v63  ;;  %3371 = vmatpush3.msra.mxu1 %v4072_v63 }
 0x39a   : > { %3216 = vmatprep.mubr.msk.f32.mxu0 %vm655_vm3, %v4052_v45  ;;  %3223 = vmatprep.subr.mxu0 %v4081_v2 }
 0x39b   : > { %3217 = vmatmul.mubr.msk.f32.gmra.mxu0 %vm655_vm3, %v4055_v53  ;;  %3367 = vmatprep.subr.mxu1 %v4081_v2 }
 0x39c   : > { %3224 = vmatpush3.msra.mxu0 %v4081_v2  ;;  %3372 = vmatpush3.msra.mxu1 %v4081_v2 }
 0x39d   : > { %3225 = vmatprep.subr.mxu0 %v4090_v4  ;;  %3368 = vmatprep.subr.mxu1 %v4090_v4 }
 0x39e   : > { %3226 = vmatpush3.msra.mxu0 %v4090_v4  ;;  %3373 = vmatpush3.msra.mxu1 %v4090_v4 }
 0x39f   : > { %3227 = vmatprep.subr.mxu0 %v4099_v50  ;;  %3369 = vmatprep.subr.mxu1 %v4099_v50 }
 0x3a0   : > { %3228 = vmatpush3.msra.mxu0 %v4099_v50  ;;  %3374 = vmatpush3.msra.mxu1 %v4099_v50 }
 0x3a1   : > { %3241 = vmatprep.subr.msk.mxu0 %vm494_vm1, %v3743_v8  ;;  %3255 = vmatprep.subr.mxu1 %v3760_v17 }
 0x44f   : > { %v3209_v57 = vpop.f32.mrf.mxu0 }
 0x450   : > { %v1325_v58 = vadd.f32 %v3209_v57, %v2900_v55 }
 0x451   : > { %v1319_v59 = vpop.f32.mrf.mxu0 }
 0x452   : > { %v1367_v60 = vmul.f32 0.70710677, %v1325_v58  ;;  %v1320_v61 = vadd.f32 %v2900_v55, %v1319_v59  ;;  %v1359_v10 = vmul.f32 0.5, %v1325_v58 }
 0x453   : > { %v3212_v56 = vpop.f32.mrf.mxu0 }
 0x454   : > { %3479 = verf.f32 %v1367_v60  ;;  %v1366_v1 = vmul.f32 0.70710677, %v1320_v61  ;;  %v1335_v11 = vadd.f32 %v3212_v56, %v2900_v55  ;;  %v1358_v52 = vmul.f32 0.5, %v1320_v61 }
 0x455   : > { %v1329_v13 = vpop.f32.mrf.mxu0 }
 0x456   : > { %3481 = verf.f32 %v1366_v1  ;;  %v1369_v28 = vmul.f32 0.70710677, %v1335_v11  ;;  %v1330_v7 = vadd.f32 %v2900_v55, %v1329_v13 }
 0x457   : > { %v3215_v29 = vpop.f32.mrf.mxu0 }
 0x458   : > { %3483 = verf.f32 %v1369_v28  ;;  %v1368_v32 = vmul.f32 0.70710677, %v1330_v7  ;;  %v1345_v34 = vadd.f32 %v3215_v29, %v2900_v55  ;;  %v1361_v28 = vmul.f32 0.5, %v1335_v11 }
 0x459   : > { %v1339_v12 = vpop.f32.mrf.mxu0 }
 0x45a   : > { %3485 = verf.f32 %v1368_v32  ;;  %v1371_v27 = vmul.f32 0.70710677, %v1345_v34  ;;  %v1340_v35 = vadd.f32 %v2900_v55, %v1339_v12  ;;  %v1360_v32 = vmul.f32 0.5, %v1330_v7 }
 0x45b   : > { %v3218_v30 = vpop.f32.mrf.mxu0  ;;  %v1363_v61 = vmul.f32 0.5, %v1345_v34 }
 0x45c   : > { %3487 = verf.f32 %v1371_v27  ;;  %v1370_v33 = vmul.f32 0.70710677, %v1340_v35  ;;  %v1355_v0 = vadd.f32 %v3218_v30, %v2900_v55 }
 0x45d   : > { %v1349_v39 = vpop.f32.mrf.mxu0 }
 0x45e   : > { %3489 = verf.f32 %v1370_v33  ;;  %v1373_v46 = vmul.f32 0.70710677, %v1355_v0  ;;  %v1350_v47 = vadd.f32 %v2900_v55, %v1349_v39 }
 0x460   : > { %3491 = verf.f32 %v1373_v46  ;;  %v1372_v48 = vmul.f32 0.70710677, %v1350_v47 }
 0x461   : > { %v3480_v36 = vpop.eup %3479 }
 0x462   : > { %v1383_v43 = vadd.f32 1.0, %v3480_v36  ;;  %3493 = verf.f32 %v1372_v48  ;;  %v1362_v48 = vmul.f32 0.5, %v1340_v35  ;;  %v1364_v35 = vmul.f32 0.5, %v1350_v47 }
 0x463   : > { %v3482_v49 = vpop.eup %3481 }
 0x464   : > { %v1382_v57 = vadd.f32 1.0, %v3482_v49  ;;  %v1391_v60 = vmul.f32 %v1383_v43, %v1359_v10  ;;  %v1365_v49 = vmul.f32 0.5, %v1355_v0 }
 0x465   : > { %v3484_v59 = vpop.eup %3483 }
 0x466   : > { %v1390_v56 = vmul.f32 %v1382_v57, %v1358_v52  ;;  %v1385_v1 = vadd.f32 1.0, %v3484_v59  ;;  %v1399_v27 = vadd.f32 %v1391_v60, %v4025_v31  ;;  %v450_v57 = vld [vmem:[%s3727_s27 + $0x18] sm:$0xff]  ;;  %v3575_v60 = vld [vmem:[#allocation2 + $0x8] sm:$0xff] }
 0x467   : > { %v3486_v13 = vpop.eup %3485 }
 0x468   : > { %v1398_v29 = vadd.f32 %v1390_v56, %v4022_v26  ;;  %v1384_v12 = vadd.f32 1.0, %v3486_v13  ;;  %v1393_v30 = vmul.f32 %v1385_v1, %v1361_v28 }
 0x469   : > { %v3488_v55 = vpop.eup %3487 }
 0x46a   : > { %v1392_v33 = vmul.f32 %v1384_v12, %v1360_v32  ;;  %v1387_v39 = vadd.f32 1.0, %v3488_v55  ;;  %3229 = vmatprep.mubr.msk.f32.mxu0 %vm655_vm3, %v1398_v29  ;;  %v1401_v7 = vadd.f32 %v1393_v30, %v4035_v44  ;;  %v449_v29 = vld [vmem:[%s3727_s27 + $0x10] sm:$0xff]  ;;  %v1560_v32 = vmul.f32 0.14142136, %v450_v57 }
 0x46b   : > { %v3490_v58 = vpop.eup %3489  ;;  %3230 = vmatmul.mubr.msk.f32.vlgmr.msra.gmra.mxu0 %vm655_vm3, %v1399_v27  ;;  %v3576_v27 = vld [vmem:[#allocation2] sm:$0xff] }
 0x46c   : > { %v1400_v46 = vadd.f32 %v1392_v33, %v4032_v37  ;;  %v1386_v11 = vadd.f32 1.0, %v3490_v58  ;;  %3242 = vmatpush3.msk.msra.mxu0 %vm494_vm1, %v3743_v8  ;;  %v1395_v31 = vmul.f32 %v1387_v39, %v1363_v61  ;;  %v452_v58 = vld [vmem:[%s3727_s27 + $0x28] sm:$0xff]  ;;  %v1559_v61 = vmul.f32 0.14142136, %v449_v29  ;;  %v3581_v29 = vld [vmem:[#allocation2 + $0x38] sm:$0xff] }
 0x46d   : > { %v3492_v26 = vpop.eup %3491  ;;  %3277 = vmatprep.subr.mxu0 %v3830_v16 }
 0x46e   : > { %v1394_v36 = vmul.f32 %v1386_v11, %v1362_v48  ;;  %v1389_v43 = vadd.f32 1.0, %v3492_v26  ;;  %3232 = vmatprep.mubr.msk.f32.mxu1 %vm655_vm3, %v1400_v46  ;;  %v1403_v8 = vadd.f32 %v1395_v31, %v4045_v51  ;;  %v3577_v11 = vld [vmem:[#allocation2 + $0x18] sm:$0xff] }
 0x46f   : > { %v3494_v34 = vpop.eup %3493  ;;  %3233 = vmatmul.mubr.msk.f32.vlgmr.msra.gmra.mxu1 %vm655_vm3, %v1401_v7 }
 0x470   : > { %v1402_v37 = vadd.f32 %v1394_v36, %v4042_v3  ;;  %v1388_v10 = vadd.f32 1.0, %v3494_v34  ;;  %3256 = vmatpush3.msra.mxu1 %v3760_v17  ;;  %v1397_v44 = vmul.f32 %v1389_v43, %v1365_v49  ;;  %v451_v36 = vld [vmem:[%s3727_s27 + $0x20] sm:$0xff]  ;;  %v1562_v43 = vmul.f32 0.14142136, %v452_v58 }
 0x471   : > { %3257 = vmatprep.subr.mxu1 %v3767_v18 }
 0x472   : > { %v1396_v52 = vmul.f32 %v1388_v10, %v1364_v35  ;;  %3235 = vmatprep.mubr.msk.f32.mxu1 %vm655_vm3, %v1402_v37  ;;  %3258 = vmatpush3.msra.mxu1 %v3767_v18  ;;  %v1405_v17 = vadd.f32 %v1397_v44, %v4055_v53  ;;  %v4144_v18 = vld [vmem:[%s4504_s7] ss:$0 sm:$0xff]  ;;  %v3578_v37 = vld [vmem:[#allocation2 + $0x10] sm:$0xff]  ;;  %v454_v44 = vld [vmem:[%s3727_s27 + $0x38] sm:$0xff] }
 0x473   : > { %3236 = vmatmul.mubr.msk.f32.gmra.mxu1 %vm655_vm3, %v1403_v8  ;;  %3259 = vmatprep.subr.mxu1 %v3774_v19 }
 0x474   : > { %v1404_v3 = vadd.f32 %v1396_v52, %v4052_v45  ;;  %3260 = vmatpush3.msra.mxu1 %v3774_v19  ;;  %v448_v19 = vld [vmem:[%s3727_s27 + $0x8] sm:$0xff]  ;;  %v1561_v52 = vmul.f32 0.14142136, %v451_v36 }
 0x475   : > { %3261 = vmatprep.subr.mxu1 %v3781_v20  ;;  %v1558_v47 = vmul.f32 0.14142136, %v448_v19  ;;  %v3579_v19 = vld [vmem:[#allocation2 + $0x28] sm:$0xff] }
 0x476   : > { %3238 = vmatprep.mubr.msk.f32.mxu1 %vm655_vm3, %v1404_v3  ;;  %3262 = vmatpush3.msra.mxu1 %v3781_v20  ;;  %v447_v20 = vld [vmem:[%s3727_s27] sm:$0xff] }
 0x477   : > { %3239 = vmatmul.mubr.msk.f32.gmra.mxu1 %vm655_vm3, %v1405_v17  ;;  %3263 = vmatprep.subr.mxu1 %v3788_v21  ;;  %v1557_v13 = vmul.f32 0.14142136, %v447_v20 }
 0x478   : > { %3264 = vmatpush3.msra.mxu1 %v3788_v21 }
 0x479   : > { %3299 = vmatprep.subr.mxu1 %v3908_v6 }
 0x52b   : > { %v3231_v51 = vpop.f32.mrf.mxu0 }
 0x52c   : > { %v4148_v45 = vadd.f32 %v3231_v51, %v4144_v18 }
 0x52d   : > { %v1502_v53 = vpop.f32.mrf.mxu0 }
 0x52e   : > { %v1542_v0 = vmul.f32 0.01, %v4148_v45  ;;  %v4153_v21 = vadd.f32 %v4144_v18, %v1502_v53 }
 0x52f   : > { %v3234_v59 = vpop.f32.mrf.mxu1 }
 0x530   : > { %v1550_v56 = vsub.f32 %v3575_v60, %v1542_v0  ;;  %v1541_v1 = vmul.f32 0.01, %v4153_v21  ;;  %v4158_v28 = vadd.f32 %v3234_v59, %v4144_v18  ;;  %v1564_v0 = vmul.f32 0.14142136, %v454_v44  ;;  %v3580_v60 = vld [vmem:[#allocation2 + $0x20] sm:$0xff] }
 0x531   : > { %v1512_v12 = vpop.f32.mrf.mxu1 }
 0x532   : > { %v1566_v55 = vadd.f32 %v1558_v47, %v1550_v56  ;;  %v1549_v30 = vsub.f32 %v3576_v27, %v1541_v1  ;;  %v1544_v33 = vmul.f32 0.01, %v4158_v28  ;;  %v4163_v39 = vadd.f32 %v4144_v18, %v1512_v12  ;;  %v453_v47 = vld [vmem:[%s3727_s27 + $0x30] sm:$0xff] }
 0x533   : > { %v3237_v46 = vpop.f32.mrf.mxu1 }
 0x534   : > { %2652 = vst.msk [vmem:[#allocation2 + $0x8] sm:$0xff] %vm469_vm2, %v1566_v55  ;;  %2660 = vst.msk [vmem:[%s3732_s10 + $0x8] sm:$0xff] %vm469_vm2, %v1566_v55  ;;  %v1565_v48 = vadd.f32 %v1557_v13, %v1549_v30  ;;  %v1552_v26 = vsub.f32 %v3577_v11, %v1544_v33  ;;  %v1543_v7 = vmul.f32 0.01, %v4163_v39  ;;  %v4171_v31 = vadd.f32 %v3237_v46, %v4144_v18  ;;  %v3583_v30 = vld [vmem:[%s4500_s3] ss:$0 sm:$0xff] }
 0x535   : > { %v1522_v34 = vpop.f32.mrf.mxu1 }
 0x536   : > { %2651 = vst.msk [vmem:[#allocation2] sm:$0xff] %vm469_vm2, %v1565_v48  ;;  %2659 = vst.msk [vmem:[%s3732_s10] sm:$0xff] %vm469_vm2, %v1565_v48  ;;  %v1568_v49 = vadd.f32 %v1560_v32, %v1552_v26  ;;  %v1551_v35 = vsub.f32 %v3578_v37, %v1543_v7  ;;  %v1546_v10 = vmul.f32 0.01, %v4171_v31  ;;  %v4179_v8 = vadd.f32 %v4144_v18, %v1522_v34 }
 0x537   : > { %3243 = vmatprep.mubr.msk.f32.mxu0 %vm469_vm2, %v1565_v48  ;;  %v3240_v3 = vpop.f32.mrf.mxu1 }
 0x538   : > { %3244 = vmatmul.mubr.msk.f32.vlgmr.msra.gmra.mxu0 %vm469_vm2, %v1566_v55  ;;  %2654 = vst.msk [vmem:[#allocation2 + $0x18] sm:$0xff] %vm469_vm2, %v1568_v49  ;;  %2662 = vst.msk [vmem:[%s3732_s10 + $0x18] sm:$0xff] %vm469_vm2, %v1568_v49  ;;  %v1567_v17 = vadd.f32 %v1559_v61, %v1551_v35  ;;  %v1554_v51 = vsub.f32 %v3579_v19, %v1546_v10  ;;  %v1545_v20 = vmul.f32 0.01, %v4179_v8  ;;  %v3582_v55 = vld [vmem:[#allocation2 + $0x30] sm:$0xff] }
 0x539   : > { %v4189_v53 = vadd.f32 %v3240_v3, %v4144_v18  ;;  %3278 = vmatpush3.msra.mxu0 %v3830_v16  ;;  %v1532_v57 = vpop.f32.mrf.mxu1 }
 0x53a   : > { %3279 = vmatprep.subr.mxu0 %v3837_v22  ;;  %2653 = vst.msk [vmem:[#allocation2 + $0x10] sm:$0xff] %vm469_vm2, %v1567_v17  ;;  %2661 = vst.msk [vmem:[%s3732_s10 + $0x10] sm:$0xff] %vm469_vm2, %v1567_v17  ;;  %v1570_v59 = vadd.f32 %v1562_v43, %v1554_v51  ;;  %v1553_v56 = vsub.f32 %v3580_v60, %v1545_v20  ;;  %v4199_v13 = vadd.f32 %v4144_v18, %v1532_v57 }
 0x53b   : > { %v1548_v1 = vmul.f32 0.01, %v4189_v53  ;;  %3246 = vmatprep.mubr.msk.f32.mxu0 %vm469_vm2, %v1567_v17  ;;  %3280 = vmatpush3.msra.mxu0 %v3837_v22  ;;  %v1563_v18 = vmul.f32 0.14142136, %v453_v47 }
 0x53c   : > { %3247 = vmatmul.mubr.msk.f32.gmra.mxu0 %vm469_vm2, %v1568_v49  ;;  %3281 = vmatprep.subr.mxu0 %v3844_v23  ;;  %2656 = vst.msk [vmem:[#allocation2 + $0x28] sm:$0xff] %vm469_vm2, %v1570_v59  ;;  %2664 = vst.msk [vmem:[%s3732_s10 + $0x28] sm:$0xff] %vm469_vm2, %v1570_v59  ;;  %v1569_v16 = vadd.f32 %v1561_v52, %v1553_v56  ;;  %v1547_v12 = vmul.f32 0.01, %v4199_v13 }
 0x53d   : > { %v1556_v32 = vsub.f32 %v3581_v29, %v1548_v1  ;;  %3282 = vmatpush3.msra.mxu0 %v3844_v23 }
 0x53e   : > { %3283 = vmatprep.subr.mxu0 %v3851_v24  ;;  %2655 = vst.msk [vmem:[#allocation2 + $0x20] sm:$0xff] %vm469_vm2, %v1569_v16  ;;  %2663 = vst.msk [vmem:[%s3732_s10 + $0x20] sm:$0xff] %vm469_vm2, %v1569_v16  ;;  %v1555_v27 = vsub.f32 %v3582_v55, %v1547_v12  ;;  %3249 = vmatprep.mubr.msk.f32.mxu0 %vm469_vm2, %v1569_v16 }
 0x53f   : > { %v1572_v22 = vadd.f32 %v1564_v0, %v1556_v32  ;;  %3284 = vmatpush3.msra.mxu0 %v3851_v24 }
 0x540   : > { %3250 = vmatmul.mubr.msk.f32.gmra.mxu0 %vm469_vm2, %v1570_v59  ;;  %3285 = vmatprep.subr.mxu0 %v3858_v25  ;;  %v1571_v23 = vadd.f32 %v1563_v18, %v1555_v27 }
 0x541   : > { %2658 = vst.msk [vmem:[#allocation2 + $0x38] sm:$0xff] %vm469_vm2, %v1572_v22  ;;  %2666 = vst.msk [vmem:[%s3732_s10 + $0x38] sm:$0xff] %vm469_vm2, %v1572_v22  ;;  %3286 = vmatpush3.msra.mxu0 %v3858_v25 }
 0x542   : > { %3321 = vmatprep.subr.mxu0 %v3986_v62  ;;  %2657 = vst.msk [vmem:[#allocation2 + $0x30] sm:$0xff] %vm469_vm2, %v1571_v23  ;;  %2665 = vst.msk [vmem:[%s3732_s10 + $0x30] sm:$0xff] %vm469_vm2, %v1571_v23  ;;  %3252 = vmatprep.mubr.msk.f32.mxu0 %vm469_vm2, %v1571_v23 }
 0x544   : > { %3253 = vmatmul.mubr.msk.f32.gmra.mxu0 %vm469_vm2, %v1572_v22 }
 0x5f8   : > { %v3245_v24 = vpop.f32.mrf.mxu0 }
 0x5f9   : > { %v1669_v33 = vadd.f32 %v3583_v30, %v3245_v24 }
 0x5fa   : > { %v1663_v58 = vpop.f32.mrf.mxu0 }
 0x5fb   : > { %v1711_v61 = vmul.f32 0.70710677, %v1669_v33  ;;  %v1664_v46 = vadd.f32 %v3583_v30, %v1663_v58  ;;  %v1703_v1 = vmul.f32 0.5, %v1669_v33 }
 0x5fc   : > { %v3248_v25 = vpop.f32.mrf.mxu0 }
 0x5fd   : > { %3495 = verf.f32 %v1711_v61  ;;  %v1710_v48 = vmul.f32 0.70710677, %v1664_v46  ;;  %v1679_v11 = vadd.f32 %v3583_v30, %v3248_v25  ;;  %v1702_v59 = vmul.f32 0.5, %v1664_v46 }
 0x5fe   : > { %v1673_v26 = vpop.f32.mrf.mxu0 }
 0x5ff   : > { %3497 = verf.f32 %v1710_v48  ;;  %v1713_v7 = vmul.f32 0.70710677, %v1679_v11  ;;  %v1674_v36 = vadd.f32 %v3583_v30, %v1673_v26  ;;  %v1705_v27 = vmul.f32 0.5, %v1679_v11 }
 0x600   : > { %v3251_v43 = vpop.f32.mrf.mxu0 }
 0x601   : > { %3499 = verf.f32 %v1713_v7  ;;  %v1712_v34 = vmul.f32 0.70710677, %v1674_v36  ;;  %v1689_v49 = vadd.f32 %v3583_v30, %v3251_v43  ;;  %v1704_v18 = vmul.f32 0.5, %v1674_v36 }
 0x602   : > { %v1683_v37 = vpop.f32.mrf.mxu0 }
 0x603   : > { %3501 = verf.f32 %v1712_v34  ;;  %v1715_v35 = vmul.f32 0.70710677, %v1689_v49  ;;  %v1684_v10 = vadd.f32 %v3583_v30, %v1683_v37  ;;  %v1707_v25 = vmul.f32 0.5, %v1689_v49  ;;  %v3584_v34 = vld [vmem:[%s4502_s5] ss:$0 sm:$0xff] }
 0x604   : > { %v3254_v44 = vpop.f32.mrf.mxu0 }
 0x605   : > { %3503 = verf.f32 %v1715_v35  ;;  %v1714_v52 = vmul.f32 0.70710677, %v1684_v10  ;;  %v1699_v3 = vadd.f32 %v3583_v30, %v3254_v44  ;;  %v1706_v58 = vmul.f32 0.5, %v1684_v10 }
 0x606   : > { %v1693_v17 = vpop.f32.mrf.mxu0 }
 0x607   : > { %3505 = verf.f32 %v1714_v52  ;;  %v1717_v19 = vmul.f32 0.70710677, %v1699_v3  ;;  %v1694_v51 = vadd.f32 %v3583_v30, %v1693_v17 }
 0x609   : > { %3507 = verf.f32 %v1717_v19  ;;  %v1716_v20 = vmul.f32 0.70710677, %v1694_v51  ;;  %v1708_v7 = vmul.f32 0.5, %v1694_v51 }
 0x60a   : > { %v3496_v0 = vpop.eup %3495 }
 0x60b   : > { %3509 = verf.f32 %v1716_v20  ;;  %v1727_v57 = vadd.f32 1.0, %v3496_v0 }
 0x60c   : > { %v3498_v47 = vpop.eup %3497 }
 0x60d   : > { %v1726_v60 = vadd.f32 1.0, %v3498_v47  ;;  %v4233_v32 = vmul.f32 %v1727_v57, %v1703_v1 }
 0x60e   : > { %v3500_v56 = vpop.eup %3499 }
 0x60f   : > { %v4231_v16 = vmul.f32 %v1726_v60, %v1702_v59  ;;  %v1729_v12 = vadd.f32 1.0, %v3500_v56 }
 0x610   : > { %v3502_v29 = vpop.eup %3501 }
 0x611   : > { %v1728_v22 = vadd.f32 1.0, %v3502_v29  ;;  %3265 = vmatprep.mubr.msk.f32.mxu1 %vm655_vm3, %v4231_v16  ;;  %v4242_v30 = vmul.f32 %v1729_v12, %v1705_v27 }
 0x612   : > { %v3504_v55 = vpop.eup %3503  ;;  %3266 = vmatmul.mubr.msk.f32.vlgmr.msra.gmra.mxu1 %vm655_vm3, %v4233_v32 }
 0x613   : > { %v4239_v23 = vmul.f32 %v1728_v22, %v1704_v18  ;;  %3300 = vmatpush3.msra.mxu1 %v3908_v6  ;;  %v1731_v33 = vadd.f32 1.0, %v3504_v55 }
 0x614   : > { %v3506_v24 = vpop.eup %3505  ;;  %3301 = vmatprep.subr.mxu1 %v3915_v9 }
 0x615   : > { %v1730_v61 = vadd.f32 1.0, %v3506_v24  ;;  %3268 = vmatprep.mubr.msk.f32.mxu1 %vm655_vm3, %v4239_v23  ;;  %3302 = vmatpush3.msra.mxu1 %v3915_v9  ;;  %v4254_v11 = vmul.f32 %v1731_v33, %v1707_v25  ;;  %v1709_v9 = vmul.f32 0.5, %v1699_v3 }
 0x616   : > { %v3508_v46 = vpop.eup %3507  ;;  %3269 = vmatmul.mubr.msk.f32.gmra.mxu1 %vm655_vm3, %v4242_v30  ;;  %3303 = vmatprep.subr.mxu1 %v3922_v14 }
 0x617   : > { %v4251_v6 = vmul.f32 %v1730_v61, %v1706_v58  ;;  %3304 = vmatpush3.msra.mxu1 %v3922_v14  ;;  %v1733_v26 = vadd.f32 1.0, %v3508_v46 }
 0x618   : > { %v3510_v48 = vpop.eup %3509  ;;  %3305 = vmatprep.subr.mxu1 %v3929_v15 }
 0x619   : > { %v1732_v36 = vadd.f32 1.0, %v3510_v48  ;;  %3271 = vmatprep.mubr.msk.f32.mxu1 %vm655_vm3, %v4251_v6  ;;  %3306 = vmatpush3.msra.mxu1 %v3929_v15  ;;  %v4266_v43 = vmul.f32 %v1733_v26, %v1709_v9 }
 0x61a   : > { %3272 = vmatmul.mubr.msk.f32.gmra.mxu1 %vm655_vm3, %v4254_v11  ;;  %3307 = vmatprep.subr.mxu1 %v3936_v42 }
 0x61b   : > { %v4263_v14 = vmul.f32 %v1732_v36, %v1708_v7  ;;  %3308 = vmatpush3.msra.mxu1 %v3936_v42 }
 0x61c   : > { %3343 = vmatprep.subr.mxu1 %v4064_v54 }
 0x61d   : > { %3274 = vmatprep.mubr.msk.f32.mxu1 %vm655_vm3, %v4263_v14 }
 0x61e   : > { %3275 = vmatmul.mubr.msk.f32.gmra.mxu1 %vm655_vm3, %v4266_v43 }
 0x6d2   : > { %v3267_v15 = vpop.f32.mrf.mxu1 }
 0x6d3   : > { %v1838_v49 = vadd.f32 %v3584_v34, %v3267_v15 }
 0x6d4   : > { %v1832_v37 = vpop.f32.mrf.mxu1 }
 0x6d5   : > { %v1880_v35 = vmul.f32 0.70710677, %v1838_v49  ;;  %v1833_v10 = vadd.f32 %v3584_v34, %v1832_v37  ;;  %v1872_v33 = vmul.f32 0.5, %v1838_v49 }
 0x6d6   : > { %v3270_v42 = vpop.f32.mrf.mxu1 }
 0x6d7   : > { %3511 = verf.f32 %v1880_v35  ;;  %v1879_v44 = vmul.f32 0.70710677, %v1833_v10  ;;  %v1848_v52 = vadd.f32 %v3584_v34, %v3270_v42  ;;  %v1871_v58 = vmul.f32 0.5, %v1833_v10 }
 0x6d8   : > { %v1842_v3 = vpop.f32.mrf.mxu1 }
 0x6d9   : > { %3513 = verf.f32 %v1879_v44  ;;  %v1882_v17 = vmul.f32 0.70710677, %v1848_v52  ;;  %v1843_v19 = vadd.f32 %v3584_v34, %v1842_v3  ;;  %v1874_v36 = vmul.f32 0.5, %v1848_v52 }
 0x6da   : > { %v3273_v51 = vpop.f32.mrf.mxu1 }
 0x6db   : > { %3515 = verf.f32 %v1882_v17  ;;  %v1881_v20 = vmul.f32 0.70710677, %v1843_v19  ;;  %v1858_v0 = vadd.f32 %v3584_v34, %v3273_v51  ;;  %v1873_v15 = vmul.f32 0.5, %v1843_v19 }
 0x6dc   : > { %v1852_v47 = vpop.f32.mrf.mxu1 }
 0x6dd   : > { %3517 = verf.f32 %v1881_v20  ;;  %v1884_v57 = vmul.f32 0.70710677, %v1858_v0  ;;  %v1853_v59 = vadd.f32 %v3584_v34, %v1852_v47  ;;  %v1876_v3 = vmul.f32 0.5, %v1858_v0 }
 0x6de   : > { %v3276_v60 = vpop.f32.mrf.mxu1 }
 0x6df   : > { %3519 = verf.f32 %v1884_v57  ;;  %v1883_v56 = vmul.f32 0.70710677, %v1853_v59  ;;  %v1868_v1 = vadd.f32 %v3584_v34, %v3276_v60  ;;  %v1875_v52 = vmul.f32 0.5, %v1853_v59 }
 0x6e0   : > { %v1862_v29 = vpop.f32.mrf.mxu1 }
 0x6e1   : > { %3521 = verf.f32 %v1883_v56  ;;  %v1886_v12 = vmul.f32 0.70710677, %v1868_v1  ;;  %v1863_v18 = vadd.f32 %v3584_v34, %v1862_v29  ;;  %v1878_v0 = vmul.f32 0.5, %v1868_v1 }
 0x6e3   : > { %3523 = verf.f32 %v1886_v12  ;;  %v1885_v22 = vmul.f32 0.70710677, %v1863_v18 }
 0x6e4   : > { %v3512_v55 = vpop.eup %3511 }
 0x6e5   : > { %v1896_v27 = vadd.f32 1.0, %v3512_v55  ;;  %3525 = verf.f32 %v1885_v22 }
 0x6e6   : > { %v3514_v24 = vpop.eup %3513 }
 0x6e7   : > { %v1895_v61 = vadd.f32 1.0, %v3514_v24  ;;  %v1904_v25 = vmul.f32 %v1896_v27, %v1872_v33 }
 0x6e8   : > { %v3516_v46 = vpop.eup %3515 }
 0x6e9   : > { %v1903_v48 = vmul.f32 %v1895_v61, %v1871_v58  ;;  %v1898_v26 = vadd.f32 1.0, %v3516_v46  ;;  %v4280_v35 = vadd.f32 %v1904_v25, %v4233_v32 }
 0x6ea   : > { %v3518_v7 = vpop.eup %3517 }
 0x6eb   : > { %v4277_v9 = vadd.f32 %v1903_v48, %v4231_v16  ;;  %v1897_v34 = vadd.f32 1.0, %v3518_v7  ;;  %v1906_v42 = vmul.f32 %v1898_v26, %v1874_v36 }
 0x6ec   : > { %v3520_v37 = vpop.eup %3519 }
 0x6ed   : > { %v1905_v44 = vmul.f32 %v1897_v34, %v1873_v15  ;;  %v1900_v49 = vadd.f32 1.0, %v3520_v37  ;;  %3287 = vmatprep.mubr.msk.f32.mxu0 %vm655_vm3, %v4277_v9  ;;  %v4291_v19 = vadd.f32 %v1906_v42, %v4242_v30  ;;  %v1877_v30 = vmul.f32 0.5, %v1863_v18 }
 0x6ee   : > { %v3522_v10 = vpop.eup %3521  ;;  %3288 = vmatmul.mubr.msk.f32.vlgmr.msra.gmra.mxu0 %vm655_vm3, %v4280_v35 }
 0x6ef   : > { %v4287_v16 = vadd.f32 %v1905_v44, %v4239_v23  ;;  %v1899_v17 = vadd.f32 1.0, %v3522_v10  ;;  %3322 = vmatpush3.msra.mxu0 %v3986_v62  ;;  %v1908_v51 = vmul.f32 %v1900_v49, %v1876_v3 }
 0x6f0   : > { %v3524_v32 = vpop.eup %3523  ;;  %3323 = vmatprep.subr.mxu0 %v3993_v38 }
 0x6f1   : > { %v1907_v20 = vmul.f32 %v1899_v17, %v1875_v52  ;;  %v1902_v47 = vadd.f32 1.0, %v3524_v32  ;;  %3290 = vmatprep.mubr.msk.f32.mxu0 %vm655_vm3, %v4287_v16  ;;  %3324 = vmatpush3.msra.mxu0 %v3993_v38  ;;  %v4305_v59 = vadd.f32 %v1908_v51, %v4254_v11  ;;  %v3585_v11 = vld [vmem:[%s4502_s5 + $0x1] ss:$0 sm:$0xff] }
 0x6f2   : > { %v3526_v23 = vpop.eup %3525  ;;  %3291 = vmatmul.mubr.msk.f32.gmra.mxu0 %vm655_vm3, %v4291_v19  ;;  %3325 = vmatprep.subr.mxu0 %v4000_v40 }
 0x6f3   : > { %v4301_v62 = vadd.f32 %v1907_v20, %v4251_v6  ;;  %v1901_v57 = vadd.f32 1.0, %v3526_v23  ;;  %3326 = vmatpush3.msra.mxu0 %v4000_v40  ;;  %v1910_v60 = vmul.f32 %v1902_v47, %v1878_v0 }
 0x6f4   : > { %3327 = vmatprep.subr.mxu0 %v4007_v41 }
 0x6f5   : > { %v1909_v38 = vmul.f32 %v1901_v57, %v1877_v30  ;;  %3293 = vmatprep.mubr.msk.f32.mxu0 %vm655_vm3, %v4301_v62  ;;  %3328 = vmatpush3.msra.mxu0 %v4007_v41  ;;  %v4319_v40 = vadd.f32 %v1910_v60, %v4266_v43 }
 0x6f6   : > { %3294 = vmatmul.mubr.msk.f32.gmra.mxu0 %vm655_vm3, %v4305_v59  ;;  %3329 = vmatprep.subr.mxu0 %v4014_v5 }
 0x6f7   : > { %v4315_v6 = vadd.f32 %v1909_v38, %v4263_v14  ;;  %3330 = vmatpush3.msra.mxu0 %v4014_v5 }
 0x6f9   : > { %3296 = vmatprep.mubr.msk.f32.mxu0 %vm655_vm3, %v4315_v6 }
 0x6fa   : > { %3297 = vmatmul.mubr.msk.f32.gmra.mxu0 %vm655_vm3, %v4319_v40 }
 0x7ae   : > { %v3289_v41 = vpop.f32.mrf.mxu0 }
 0x7af   : > { %v2015_v56 = vadd.f32 %v3585_v11, %v3289_v41 }
 0x7b0   : > { %v2009_v1 = vpop.f32.mrf.mxu0 }
 0x7b1   : > { %v2057_v14 = vmul.f32 0.70710677, %v2015_v56  ;;  %v2010_v29 = vadd.f32 %v3585_v11, %v2009_v1  ;;  %v2049_v49 = vmul.f32 0.5, %v2015_v56 }
 0x7b2   : > { %v3292_v12 = vpop.f32.mrf.mxu0 }
 0x7b3   : > { %3527 = verf.f32 %v2057_v14  ;;  %v2056_v5 = vmul.f32 0.70710677, %v2010_v29  ;;  %v2025_v43 = vadd.f32 %v3585_v11, %v3292_v12  ;;  %v2048_v10 = vmul.f32 0.5, %v2010_v29 }
 0x7b4   : > { %v2019_v18 = vpop.f32.mrf.mxu0 }
 0x7b5   : > { %3529 = verf.f32 %v2056_v5  ;;  %v2059_v22 = vmul.f32 0.70710677, %v2025_v43  ;;  %v2020_v55 = vadd.f32 %v3585_v11, %v2019_v18  ;;  %v2051_v47 = vmul.f32 0.5, %v2025_v43 }
 0x7b6   : > { %v3295_v27 = vpop.f32.mrf.mxu0 }
 0x7b7   : > { %3531 = verf.f32 %v2059_v22  ;;  %v2058_v24 = vmul.f32 0.70710677, %v2020_v55  ;;  %v2035_v33 = vadd.f32 %v3585_v11, %v3295_v27  ;;  %v2050_v0 = vmul.f32 0.5, %v2020_v55 }
 0x7b8   : > { %v2029_v58 = vpop.f32.mrf.mxu0 }
 0x7b9   : > { %3533 = verf.f32 %v2058_v24  ;;  %v2061_v61 = vmul.f32 0.70710677, %v2035_v33  ;;  %v2030_v46 = vadd.f32 %v3585_v11, %v2029_v58  ;;  %v2053_v1 = vmul.f32 0.5, %v2035_v33 }
 0x7ba   : > { %v3298_v25 = vpop.f32.mrf.mxu0 }
 0x7bb   : > { %3535 = verf.f32 %v2061_v61  ;;  %v2060_v48 = vmul.f32 0.70710677, %v2030_v46  ;;  %v2045_v26 = vadd.f32 %v3585_v11, %v3298_v25  ;;  %v2052_v14 = vmul.f32 0.5, %v2030_v46 }
 0x7bc   : > { %v2039_v7 = vpop.f32.mrf.mxu0 }
 0x7bd   : > { %3537 = verf.f32 %v2060_v48  ;;  %v2063_v36 = vmul.f32 0.70710677, %v2045_v26  ;;  %v2040_v15 = vadd.f32 %v3585_v11, %v2039_v7  ;;  %v2055_v22 = vmul.f32 0.5, %v2045_v26 }
 0x7bf   : > { %3539 = verf.f32 %v2063_v36  ;;  %v2062_v34 = vmul.f32 0.70710677, %v2040_v15 }
 0x7c0   : > { %v3528_v37 = vpop.eup %3527 }
 0x7c1   : > { %v2073_v42 = vadd.f32 1.0, %v3528_v37  ;;  %3541 = verf.f32 %v2062_v34 }
 0x7c2   : > { %v3530_v44 = vpop.eup %3529 }
 0x7c3   : > { %v2072_v3 = vadd.f32 1.0, %v3530_v44  ;;  %v2081_v17 = vmul.f32 %v2073_v42, %v2049_v49 }
 0x7c4   : > { %v3532_v52 = vpop.eup %3531 }
 0x7c5   : > { %v2080_v32 = vmul.f32 %v2072_v3, %v2048_v10  ;;  %v2075_v51 = vadd.f32 1.0, %v3532_v52  ;;  %v4332_v60 = vadd.f32 %v2081_v17, %v4280_v35 }
 0x7c6   : > { %v3534_v20 = vpop.eup %3533 }
 0x7c7   : > { %v4329_v23 = vadd.f32 %v2080_v32, %v4277_v9  ;;  %v2074_v30 = vadd.f32 1.0, %v3534_v20  ;;  %v2083_v38 = vmul.f32 %v2075_v51, %v2051_v47 }
 0x7c8   : > { %v3536_v57 = vpop.eup %3535 }
 0x7c9   : > { %v2082_v41 = vmul.f32 %v2074_v30, %v2050_v0  ;;  %v2077_v11 = vadd.f32 1.0, %v3536_v57  ;;  %3309 = vmatprep.mubr.msk.f32.mxu1 %vm655_vm3, %v4329_v23  ;;  %v4343_v12 = vadd.f32 %v2083_v38, %v4291_v19  ;;  %v2054_v19 = vmul.f32 0.5, %v2040_v15 }
 0x7ca   : > { %v3538_v56 = vpop.eup %3537  ;;  %3310 = vmatmul.mubr.msk.f32.vlgmr.msra.gmra.mxu1 %vm655_vm3, %v4332_v60 }
 0x7cb   : > { %v4339_v9 = vadd.f32 %v2082_v41, %v4287_v16  ;;  %v2076_v29 = vadd.f32 1.0, %v3538_v56  ;;  %3344 = vmatpush3.msra.mxu1 %v4064_v54  ;;  %v2085_v5 = vmul.f32 %v2077_v11, %v2053_v1 }
 0x7cc   : > { %v3540_v35 = vpop.eup %3539  ;;  %3345 = vmatprep.subr.mxu1 %v4072_v63 }
 0x7cd   : > { %v2084_v43 = vmul.f32 %v2076_v29, %v2052_v14  ;;  %v2079_v18 = vadd.f32 1.0, %v3540_v35  ;;  %3312 = vmatprep.mubr.msk.f32.mxu1 %vm655_vm3, %v4339_v9  ;;  %3346 = vmatpush3.msra.mxu1 %v4072_v63  ;;  %v4357_v27 = vadd.f32 %v2085_v5, %v4305_v59  ;;  %v3586_v59 = vld [vmem:[%s4502_s5 + $0x2] ss:$0 sm:$0xff] }
 0x7ce   : > { %v3542_v16 = vpop.eup %3541  ;;  %3313 = vmatmul.mubr.msk.f32.gmra.mxu1 %vm655_vm3, %v4343_v12  ;;  %3347 = vmatprep.subr.mxu1 %v4081_v2 }
 0x7cf   : > { %v4353_v54 = vadd.f32 %v2084_v43, %v4301_v62  ;;  %v2078_v55 = vadd.f32 1.0, %v3542_v16  ;;  %3348 = vmatpush3.msra.mxu1 %v4081_v2  ;;  %v2087_v24 = vmul.f32 %v2079_v18, %v2055_v22 }
 0x7d0   : > { %3349 = vmatprep.subr.mxu1 %v4090_v4 }
 0x7d1   : > { %v2086_v63 = vmul.f32 %v2078_v55, %v2054_v19  ;;  %3315 = vmatprep.mubr.msk.f32.mxu1 %vm655_vm3, %v4353_v54  ;;  %3350 = vmatpush3.msra.mxu1 %v4090_v4  ;;  %v4371_v2 = vadd.f32 %v2087_v24, %v4319_v40 }
 0x7d2   : > { %3316 = vmatmul.mubr.msk.f32.gmra.mxu1 %vm655_vm3, %v4357_v27  ;;  %3351 = vmatprep.subr.mxu1 %v4099_v50 }
 0x7d3   : > { %v4367_v62 = vadd.f32 %v2086_v63, %v4315_v6  ;;  %3352 = vmatpush3.msra.mxu1 %v4099_v50 }
 0x7d5   : > { %3318 = vmatprep.mubr.msk.f32.mxu1 %vm655_vm3, %v4367_v62 }
 0x7d6   : > { %3319 = vmatmul.mubr.msk.f32.gmra.mxu1 %vm655_vm3, %v4371_v2 }
 0x88a   : > { %v3311_v4 = vpop.f32.mrf.mxu1 }
 0x88b   : > { %v2192_v33 = vadd.f32 %v3586_v59, %v3311_v4 }
 0x88c   : > { %v2186_v58 = vpop.f32.mrf.mxu1 }
 0x88d   : > { %v2234_v6 = vmul.f32 0.70710677, %v2192_v33  ;;  %v2187_v61 = vadd.f32 %v3586_v59, %v2186_v58  ;;  %v2226_v0 = vmul.f32 0.5, %v2192_v33 }
 0x88e   : > { %v3314_v46 = vpop.f32.mrf.mxu1 }
 0x88f   : > { %3543 = verf.f32 %v2234_v6  ;;  %v2233_v50 = vmul.f32 0.70710677, %v2187_v61  ;;  %v2202_v40 = vadd.f32 %v3586_v59, %v3314_v46  ;;  %v2225_v30 = vmul.f32 0.5, %v2187_v61 }
 0x890   : > { %v2196_v25 = vpop.f32.mrf.mxu1 }
 0x891   : > { %3545 = verf.f32 %v2233_v50  ;;  %v2236_v48 = vmul.f32 0.70710677, %v2202_v40  ;;  %v2197_v26 = vadd.f32 %v3586_v59, %v2196_v25  ;;  %v2228_v14 = vmul.f32 0.5, %v2202_v40 }
 0x892   : > { %v3317_v7 = vpop.f32.mrf.mxu1 }
 0x893   : > { %3547 = verf.f32 %v2236_v48  ;;  %v2235_v36 = vmul.f32 0.70710677, %v2197_v26  ;;  %v2212_v15 = vadd.f32 %v3586_v59, %v3317_v7  ;;  %v2227_v35 = vmul.f32 0.5, %v2197_v26 }
 0x894   : > { %v2206_v34 = vpop.f32.mrf.mxu1 }
 0x895   : > { %3549 = verf.f32 %v2235_v36  ;;  %v2238_v37 = vmul.f32 0.70710677, %v2212_v15  ;;  %v2207_v42 = vadd.f32 %v3586_v59, %v2206_v34  ;;  %v2230_v24 = vmul.f32 0.5, %v2212_v15 }
 0x896   : > { %v3320_v44 = vpop.f32.mrf.mxu1 }
 0x897   : > { %3551 = verf.f32 %v2238_v37  ;;  %v2237_v49 = vmul.f32 0.70710677, %v2207_v42  ;;  %v2222_v10 = vadd.f32 %v3586_v59, %v3320_v44  ;;  %v2229_v63 = vmul.f32 0.5, %v2207_v42 }
 0x898   : > { %v2216_v3 = vpop.f32.mrf.mxu1 }
 0x899   : > { %3553 = verf.f32 %v2237_v49  ;;  %v2240_v52 = vmul.f32 0.70710677, %v2222_v10  ;;  %v2217_v17 = vadd.f32 %v3586_v59, %v2216_v3  ;;  %v2232_v46 = vmul.f32 0.5, %v2222_v10 }
 0x89b   : > { %3555 = verf.f32 %v2240_v52  ;;  %v2239_v32 = vmul.f32 0.70710677, %v2217_v17  ;;  %v2231_v50 = vmul.f32 0.5, %v2217_v17 }
 0x89c   : > { %v3544_v51 = vpop.eup %3543 }
 0x89d   : > { %v2250_v20 = vadd.f32 1.0, %v3544_v51  ;;  %3557 = verf.f32 %v2239_v32 }
 0x89e   : > { %v3546_v47 = vpop.eup %3545 }
 0x89f   : > { %v2249_v57 = vadd.f32 1.0, %v3546_v47  ;;  %v2258_v41 = vmul.f32 %v2250_v20, %v2226_v0 }
 0x8a0   : > { %v3548_v38 = vpop.eup %3547 }
 0x8a1   : > { %v2257_v11 = vmul.f32 %v2249_v57, %v2225_v30  ;;  %v2252_v56 = vadd.f32 1.0, %v3548_v38  ;;  %v4384_v18 = vadd.f32 %v2258_v41, %v4332_v60 }
 0x8a2   : > { %v3550_v1 = vpop.eup %3549 }
 0x8a3   : > { %v4381_v29 = vadd.f32 %v2257_v11, %v4329_v23  ;;  %v2251_v5 = vadd.f32 1.0, %v3550_v1  ;;  %v2260_v16 = vmul.f32 %v2252_v56, %v2228_v14 }
 0x8a4   : > { %v3552_v43 = vpop.eup %3551 }
 0x8a5   : > { %v2259_v22 = vmul.f32 %v2251_v5, %v2227_v35  ;;  %v2254_v19 = vadd.f32 1.0, %v3552_v43  ;;  %3331 = vmatprep.mubr.msk.f32.mxu0 %vm655_vm3, %v4381_v29  ;;  %v4394_v60 = vadd.f32 %v2260_v16, %v4343_v12 }
 0x8a6   : > { %v3554_v55 = vpop.eup %3553  ;;  %3332 = vmatmul.mubr.msk.f32.vlgmr.msra.gmra.mxu0 %vm655_vm3, %v4384_v18 }
 0x8a7   : > { %v4391_v23 = vadd.f32 %v2259_v22, %v4339_v9  ;;  %v2253_v4 = vadd.f32 1.0, %v3554_v55  ;;  %v2262_v33 = vmul.f32 %v2254_v19, %v2230_v24 }
 0x8a8   : > { %v3556_v59 = vpop.eup %3555 }
 0x8a9   : > { %v2261_v58 = vmul.f32 %v2253_v4, %v2229_v63  ;;  %v2256_v6 = vadd.f32 1.0, %v3556_v59  ;;  %3334 = vmatprep.mubr.msk.f32.mxu0 %vm655_vm3, %v4391_v23  ;;  %v4404_v25 = vadd.f32 %v2262_v33, %v4357_v27  ;;  %v3587_v27 = vld [vmem:[%s4502_s5 + $0x3] ss:$0 sm:$0xff] }
 0x8aa   : > { %v3558_v61 = vpop.eup %3557  ;;  %3335 = vmatmul.mubr.msk.f32.gmra.mxu0 %vm655_vm3, %v4394_v60 }
 0x8ab   : > { %v4401_v9 = vadd.f32 %v2261_v58, %v4353_v54  ;;  %v2255_v40 = vadd.f32 1.0, %v3558_v61  ;;  %v2264_v12 = vmul.f32 %v2256_v6, %v2232_v46 }
 0x8ad   : > { %v2263_v48 = vmul.f32 %v2255_v40, %v2231_v50  ;;  %3337 = vmatprep.mubr.msk.f32.mxu0 %vm655_vm3, %v4401_v9  ;;  %v4414_v7 = vadd.f32 %v2264_v12, %v4371_v2 }
 0x8ae   : > { %3338 = vmatmul.mubr.msk.f32.gmra.mxu0 %vm655_vm3, %v4404_v25 }
 0x8af   : > { %v4411_v26 = vadd.f32 %v2263_v48, %v4367_v62 }
 0x8b1   : > { %3340 = vmatprep.mubr.msk.f32.mxu0 %vm655_vm3, %v4411_v26 }
 0x8b2   : > { %3341 = vmatmul.mubr.msk.f32.gmra.mxu0 %vm655_vm3, %v4414_v7 }
 0x966   : > { %v3333_v54 = vpop.f32.mrf.mxu0 }
 0x967   : > { %v2369_v36 = vadd.f32 %v3587_v27, %v3333_v54 }
 0x968   : > { %v2363_v15 = vpop.f32.mrf.mxu0 }
 0x969   : > { %v2411_v34 = vmul.f32 0.70710677, %v2369_v36  ;;  %v2364_v37 = vadd.f32 %v3587_v27, %v2363_v15  ;;  %v2403_v35 = vmul.f32 0.5, %v2369_v36 }
 0x96a   : > { %v3336_v62 = vpop.f32.mrf.mxu0 }
 0x96b   : > { %3559 = verf.f32 %v2411_v34  ;;  %v2410_v42 = vmul.f32 0.70710677, %v2364_v37  ;;  %v2379_v2 = vadd.f32 %v3587_v27, %v3336_v62  ;;  %v2402_v5 = vmul.f32 0.5, %v2364_v37 }
 0x96c   : > { %v2373_v44 = vpop.f32.mrf.mxu0 }
 0x96d   : > { %3561 = verf.f32 %v2410_v42  ;;  %v2413_v49 = vmul.f32 0.70710677, %v2379_v2  ;;  %v2374_v10 = vadd.f32 %v3587_v27, %v2373_v44  ;;  %v2405_v63 = vmul.f32 0.5, %v2379_v2 }
 0x96e   : > { %v3339_v3 = vpop.f32.mrf.mxu0 }
 0x96f   : > { %3563 = verf.f32 %v2413_v49  ;;  %v2412_v52 = vmul.f32 0.70710677, %v2374_v10  ;;  %v2389_v17 = vadd.f32 %v3587_v27, %v3339_v3  ;;  %v2404_v59 = vmul.f32 0.5, %v2374_v10 }
 0x970   : > { %v2383_v32 = vpop.f32.mrf.mxu0 }
 0x971   : > { %3565 = verf.f32 %v2412_v52  ;;  %v2415_v51 = vmul.f32 0.70710677, %v2389_v17  ;;  %v2384_v20 = vadd.f32 %v3587_v27, %v2383_v32  ;;  %v2407_v12 = vmul.f32 0.5, %v2389_v17 }
 0x972   : > { %v3342_v47 = vpop.f32.mrf.mxu0 }
 0x973   : > { %3567 = verf.f32 %v2415_v51  ;;  %v2414_v0 = vmul.f32 0.70710677, %v2384_v20  ;;  %v2399_v30 = vadd.f32 %v3587_v27, %v3342_v47  ;;  %v2406_v54 = vmul.f32 0.5, %v2384_v20  ;;  %v3589_v20 = vld [vmem:[%s3727_s27 + $0x8] sm:$0xff] }
 0x974   : > { %v2393_v57 = vpop.f32.mrf.mxu0 }
 0x975   : > { %3569 = verf.f32 %v2414_v0  ;;  %v2417_v38 = vmul.f32 0.70710677, %v2399_v30  ;;  %v2394_v41 = vadd.f32 %v3587_v27, %v2393_v57  ;;  %v2409_v62 = vmul.f32 0.5, %v2399_v30 }
 0x977   : > { %3571 = verf.f32 %v2417_v38  ;;  %v2416_v11 = vmul.f32 0.70710677, %v2394_v41  ;;  %v2408_v2 = vmul.f32 0.5, %v2394_v41  ;;  %v3590_v38 = vld [vmem:[%s3727_s27] sm:$0xff] }
 0x978   : > { %v3560_v56 = vpop.eup %3559  ;;  %v2595_v41 = vmul.f32 2.0, %v3590_v38 }
 0x979   : > { %v2427_v1 = vadd.f32 1.0, %v3560_v56  ;;  %3573 = verf.f32 %v2416_v11 }
 0x97a   : > { %v3562_v14 = vpop.eup %3561 }
 0x97b   : > { %v2426_v43 = vadd.f32 1.0, %v3562_v14  ;;  %v2435_v22 = vmul.f32 %v2427_v1, %v2403_v35 }
 0x97c   : > { %v3564_v16 = vpop.eup %3563 }
 0x97d   : > { %v2434_v19 = vmul.f32 %v2426_v43, %v2402_v5  ;;  %v2429_v55 = vadd.f32 1.0, %v3564_v16  ;;  %v2443_v6 = vadd.f32 %v2435_v22, %v4384_v18  ;;  %v3592_v43 = vld [vmem:[%s3727_s27 + $0x10] sm:$0xff] }
 0x97e   : > { %v3566_v24 = vpop.eup %3565  ;;  %v2597_v16 = vmul.f32 2.0, %v3592_v43 }
 0x97f   : > { %v2442_v4 = vadd.f32 %v2434_v19, %v4381_v29  ;;  %v2428_v33 = vadd.f32 1.0, %v3566_v24  ;;  %v2437_v61 = vmul.f32 %v2429_v55, %v2405_v63 }
 0x980   : > { %v3568_v58 = vpop.eup %3567 }
 0x981   : > { %v2436_v46 = vmul.f32 %v2428_v33, %v2404_v59  ;;  %v2431_v50 = vadd.f32 1.0, %v3568_v58  ;;  %3353 = vmatprep.mubr.msk.f32.mxu1 %vm655_vm3, %v2442_v4  ;;  %v2445_v29 = vadd.f32 %v2437_v61, %v4394_v60 }
 0x982   : > { %v3570_v40 = vpop.eup %3569  ;;  %3354 = vmatmul.mubr.msk.f32.vlgmr.msra.gmra.mxu1 %vm655_vm3, %v2443_v6 }
 0x983   : > { %v2444_v48 = vadd.f32 %v2436_v46, %v4391_v23  ;;  %v2430_v27 = vadd.f32 1.0, %v3570_v40  ;;  %v2439_v15 = vmul.f32 %v2431_v50, %v2407_v12  ;;  %v3593_v46 = vld [vmem:[%s3727_s27 + $0x20] sm:$0xff]  ;;  %v3594_v40 = vld [vmem:[%s3727_s27 + $0x28] sm:$0xff] }
 0x984   : > { %v3572_v36 = vpop.eup %3571  ;;  %v2599_v50 = vmul.f32 2.0, %v3593_v46  ;;  %v2600_v12 = vmul.f32 2.0, %v3594_v40 }
 0x985   : > { %v2438_v34 = vmul.f32 %v2430_v27, %v2406_v54  ;;  %v2433_v37 = vadd.f32 1.0, %v3572_v36  ;;  %3356 = vmatprep.mubr.msk.f32.mxu1 %vm655_vm3, %v2444_v48  ;;  %v2447_v23 = vadd.f32 %v2439_v15, %v4404_v25  ;;  %v3588_v25 = vld [vmem:[%s4504_s7] ss:$0 sm:$0xff] }
 0x986   : > { %v3574_v18 = vpop.eup %3573  ;;  %3357 = vmatmul.mubr.msk.f32.gmra.mxu1 %vm655_vm3, %v2445_v29 }
 0x987   : > { %v2446_v42 = vadd.f32 %v2438_v34, %v4401_v9  ;;  %v2432_v44 = vadd.f32 1.0, %v3574_v18  ;;  %v2441_v49 = vmul.f32 %v2433_v37, %v2409_v62 }
 0x989   : > { %v2440_v10 = vmul.f32 %v2432_v44, %v2408_v2  ;;  %3359 = vmatprep.mubr.msk.f32.mxu1 %vm655_vm3, %v2446_v42  ;;  %v2449_v3 = vadd.f32 %v2441_v49, %v4414_v7  ;;  %v3595_v2 = vld [vmem:[%s3727_s27 + $0x38] sm:$0xff] }
 0x98a   : > { %3360 = vmatmul.mubr.msk.f32.gmra.mxu1 %vm655_vm3, %v2447_v23  ;;  %v2602_v44 = vmul.f32 2.0, %v3595_v2 }
 0x98b   : > { %v2448_v60 = vadd.f32 %v2440_v10, %v4411_v26  ;;  %v2596_v26 = vmul.f32 2.0, %v3589_v20  ;;  %v3596_v10 = vld [vmem:[%s3727_s27 + $0x30] sm:$0xff] }
 0x98d   : > { %3362 = vmatprep.mubr.msk.f32.mxu1 %vm655_vm3, %v2448_v60  ;;  %v2601_v60 = vmul.f32 2.0, %v3596_v10 }
 0x98e   : > { %3363 = vmatmul.mubr.msk.f32.gmra.mxu1 %vm655_vm3, %v2449_v3 }
 0xa42   : > { %v3355_v9 = vpop.f32.mrf.mxu1 }
 0xa43   : > { %v2546_v52 = vadd.f32 %v3588_v25, %v3355_v9 }
 0xa44   : > { %v2540_v17 = vpop.f32.mrf.mxu1 }
 0xa45   : > { %v2580_v32 = vadd.f32 %v2546_v52, %v4148_v45  ;;  %v2541_v51 = vadd.f32 %v3588_v25, %v2540_v17  ;;  %v3591_v45 = vld [vmem:[%s3727_s27 + $0x18] sm:$0xff] }
 0xa46   : > { %v3358_v7 = vpop.f32.mrf.mxu1  ;;  %v2598_v5 = vmul.f32 2.0, %v3591_v45 }
 0xa47   : > { %v2588_v47 = vmul.f32 0.07071068, %v2580_v32  ;;  %v2579_v0 = vadd.f32 %v2541_v51, %v4153_v21  ;;  %v2556_v30 = vadd.f32 %v3588_v25, %v3358_v7 }
 0xa48   : > { %v2550_v57 = vpop.f32.mrf.mxu1 }
 0xa49   : > { %v2587_v11 = vmul.f32 0.07071068, %v2579_v0  ;;  %v2582_v56 = vadd.f32 %v2556_v30, %v4158_v28  ;;  %v2551_v1 = vadd.f32 %v3588_v25, %v2550_v57  ;;  %v2604_v14 = vsub.f32 %v2588_v47, %v2596_v26 }
 0xa4a   : > { %v3361_v35 = vpop.f32.mrf.mxu1 }
 0xa4b   : > { %v2590_v22 = vmul.f32 0.07071068, %v2582_v56  ;;  %v2581_v19 = vadd.f32 %v2551_v1, %v4163_v39  ;;  %v2566_v21 = vadd.f32 %v3588_v25, %v3361_v35  ;;  %v2612_v55 = vmul.f32 %v2604_v14, %v2588_v47 }
 0xa4c   : > { %v2560_v24 = vpop.f32.mrf.mxu1  ;;  %v2603_v63 = vsub.f32 %v2587_v11, %v2595_v41 }
 0xa4d   : > { %v2589_v4 = vmul.f32 0.07071068, %v2581_v19  ;;  %v2584_v59 = vadd.f32 %v2566_v21, %v4171_v31  ;;  %v2561_v28 = vadd.f32 %v3588_v25, %v2560_v24  ;;  %v2622_v33 = vsel %vm469_vm2, %v2612_v55, 0.0 }
 0xa4e   : > { %2623 = vadd.xlane.f32.xlu0 %v2622_v33  ;;  %v3364_v58 = vpop.f32.mrf.mxu1  ;;  %v2606_v6 = vsub.f32 %v2590_v22, %v2598_v5  ;;  %v2611_v61 = vmul.f32 %v2603_v63, %v2587_v11 }
 0xa4f   : > { %v2592_v39 = vmul.f32 0.07071068, %v2584_v59  ;;  %v2583_v48 = vadd.f32 %v2561_v28, %v4179_v8  ;;  %v2576_v54 = vadd.f32 %v3588_v25, %v3364_v58  ;;  %v2605_v27 = vsub.f32 %v2589_v4, %v2597_v16 }
 0xa50   : > { %v2570_v36 = vpop.f32.mrf.mxu1  ;;  %v2614_v31 = vmul.f32 %v2606_v6, %v2590_v22  ;;  %v2619_v37 = vsel %vm469_vm2, %v2611_v61, 0.0 }
 0xa51   : > { %v2591_v29 = vmul.f32 0.07071068, %v2583_v48  ;;  %v2586_v15 = vadd.f32 %v2576_v54, %v4189_v53  ;;  %v2571_v34 = vadd.f32 %v3588_v25, %v2570_v36  ;;  %v2613_v62 = vmul.f32 %v2605_v27, %v2589_v4 }
 0xa52   : > { %v2628_v18 = vsel %vm469_vm2, %v2614_v31, 0.0  ;;  %2620 = vadd.xlane.f32.xlu0 %v2619_v37  ;;  %v2608_v42 = vsub.f32 %v2592_v39, %v2600_v12 }
 0xa53   : > { %v2594_v23 = vmul.f32 0.07071068, %v2586_v15  ;;  %v2585_v8 = vadd.f32 %v2571_v34, %v4199_v13  ;;  %2629 = vadd.xlane.f32.xlu1 %v2628_v18  ;;  %v2607_v49 = vsub.f32 %v2591_v29, %v2599_v50  ;;  %v2625_v53 = vsel %vm469_vm2, %v2613_v62, 0.0 }
 0xa54   : > { %v2616_v25 = vmul.f32 %v2608_v42, %v2592_v39 }
 0xa55   : > { %v2593_v3 = vmul.f32 0.07071068, %v2585_v8  ;;  %v2615_v9 = vmul.f32 %v2607_v49, %v2591_v29  ;;  %v2610_v52 = vsub.f32 %v2594_v23, %v2602_v44 }
 0xa56   : > { %v2634_v13 = vsel %vm469_vm2, %v2616_v25, 0.0 }
 0xa57   : > { %2626 = vadd.xlane.f32.xlu1 %v2625_v53  ;;  %v2631_v17 = vsel %vm469_vm2, %v2615_v9, 0.0  ;;  %v2609_v32 = vsub.f32 %v2593_v3, %v2601_v60  ;;  %v2618_v20 = vmul.f32 %v2610_v52, %v2594_v23 }
 0xa58   : > { %2632 = vadd.xlane.f32.xlu0 %v2631_v17 }
 0xa59   : > { %v2617_v51 = vmul.f32 %v2609_v32, %v2593_v3  ;;  %v2640_v7 = vsel %vm469_vm2, %v2618_v20, 0.0 }
 0xa5b   : > { %2635 = vadd.xlane.f32.xlu1 %v2634_v13  ;;  %v2637_v26 = vsel %vm469_vm2, %v2617_v51, 0.0 }
 0xa5c   : > { %2638 = vadd.xlane.f32.xlu0 %v2637_v26 }
 0xa5f   : > { %2641 = vadd.xlane.f32.xlu1 %v2640_v7 }
 0xad7   : > { %v2624_v47 = vpop.xlane.xlu0 %2623 }
 0xad8   : > { %v2644_v0 = vmul.f32 -0.5, %v2624_v47 }
 0xada   : > { %2669 = vst.msk [vmem:[%s3737_s17 + $0x8] sm:$0xff] %vm2667_vm4, %v2644_v0 }
 0xadb   : > { %v2621_v30 = vpop.xlane.xlu0 %2620 }
 0xadc   : > { %v2630_v57 = vpop.xlane.xlu1 %2629  ;;  %v2643_v38 = vmul.f32 -0.5, %v2621_v30 }
 0xadd   : > { %v2646_v41 = vmul.f32 -0.5, %v2630_v57 }
 0xade   : > { %2668 = vst.msk [vmem:[%s3737_s17] sm:$0xff] %vm2667_vm4, %v2643_v38 }
 0xadf   : > { %2671 = vst.msk [vmem:[%s3737_s17 + $0x18] sm:$0xff] %vm2667_vm4, %v2646_v41 }
 0xae0   : > { %v2627_v11 = vpop.xlane.xlu1 %2626 }
 0xae1   : > { %v2645_v56 = vmul.f32 -0.5, %v2627_v11  ;;  %v2633_v1 = vpop.xlane.xlu0 %2632 }
 0xae2   : > { %v2647_v14 = vmul.f32 -0.5, %v2633_v1 }
 0xae3   : > { %2670 = vst.msk [vmem:[%s3737_s17 + $0x10] sm:$0xff] %vm2667_vm4, %v2645_v56 }
 0xae4   : > { %2672 = vst.msk [vmem:[%s3737_s17 + $0x20] sm:$0xff] %vm2667_vm4, %v2647_v14  ;;  %v2636_v35 = vpop.xlane.xlu1 %2635 }
 0xae5   : > { %v2648_v45 = vmul.f32 -0.5, %v2636_v35  ;;  %v2639_v5 = vpop.xlane.xlu0 %2638 }
 0xae6   : > { %v2649_v43 = vmul.f32 -0.5, %v2639_v5 }
 0xae7   : > { %2673 = vst.msk [vmem:[%s3737_s17 + $0x28] sm:$0xff] %vm2667_vm4, %v2648_v45 }
 0xae8   : > { %2674 = vst.msk [vmem:[%s3737_s17 + $0x30] sm:$0xff] %vm2667_vm4, %v2649_v43  ;;  %v2642_v16 = vpop.xlane.xlu1 %2641 }
 0xae9   : > { %v2650_v22 = vmul.f32 -0.5, %v2642_v16 }
 0xaeb   : > { %2675 = vst.msk [vmem:[%s3737_s17 + $0x38] sm:$0xff] %vm2667_vm4, %v2650_v22 }
 0xaec PF: > { %s20_s13 = sadd.s32 1, %s3635_s13   ;;  %s4509_s27 = sld [smem:[#allocation3_spill]] }
 0xaed   : > { %p17_p8 = scmp.ge.s32.totalorder %s20_s13, 18   ;;  %s4510_s14 = sld [smem:[#allocation4_spill]] }
 0xaee   : > { %s4511_s30 = smov %s3627_s11  ;;  %s4512_s10 = smov %s3631_s12 }
 0xaef   :  { %19 = sbr.rel (!%p17_p8) target bundleno = 3 (0x3), region = 107 }
 0xaf2   : > { %s4513_s11 = smov %s4509_s27 }
 0xaf3   : > { %s4514_s12 = smov %s4510_s14 }

</bundles_post_ra>
